<compile_context>
chip_gen: v6e
topology: v6e:2x2x1
jax: 0.10.0
libtpu: 0.0.40
codegen_flags: <defaults>
</compile_context>

<pallas_src>
import jax
import jax.numpy as jnp
from jax.experimental import pallas as pl
from jax.experimental.pallas import tpu as pltpu


# ----------------------------------------------------------------------------
# Kernel
# ----------------------------------------------------------------------------
def bridge_down_kernel(x_ref, w_ref, b_ref, o_ref, pad_ref, slab_ref):
    # x_ref   : (1, H2, 2*W2, 2*Cin) bf16  -- row-major reinterp of NHWC pooling pairs
    # w_ref   : (9*Cin, TCout)       bf16  -- tap-major (ky*3+kx major, cin minor)
    # b_ref   : (1, TCout)           f32
    # o_ref   : (1, H2*W2, TCout)    f32
    # pad_ref : VMEM (H2+2, W2+2, Cin) bf16 -- zero border == conv padding=1
    # slab_ref: VMEM (H2, W2, 9*Cin)   bf16 -- im2col patch slab
    _, H2, W2x2, Cin2 = x_ref.shape
    W2, Cin = W2x2 // 2, Cin2 // 2

    # ---- MaxPool2d(2): max over h-parity halves, then w-parity channel halves.
    #      (bf16 max; v5e legalizes via implicit widen, exact for max.)
    xa = x_ref[0]                                          # (H2, 2*W2, 2*Cin)
    m = jnp.maximum(xa[:, :W2, :], xa[:, W2:, :])          # rows 2h vs 2h+1
    pooled = jnp.maximum(m[:, :, :Cin], m[:, :, Cin:])     # cols 2w vs 2w+1
    # pooled: (H2, W2, Cin) bf16

    # ---- Zero only the 1-px border (conv padding=1); interior is overwritten
    #      every step, so this is megacore-safe and ~60x cheaper than a full
    #      scratch clear.
    zero_row = jnp.zeros((1, W2 + 2, Cin), pad_ref.dtype)
    zero_col = jnp.zeros((H2, 1, Cin), pad_ref.dtype)
    pad_ref[pl.ds(0, 1), :, :] = zero_row
    pad_ref[pl.ds(H2 + 1, 1), :, :] = zero_row
    pad_ref[pl.ds(1, H2), pl.ds(0, 1), :] = zero_col
    pad_ref[pl.ds(1, H2), pl.ds(W2 + 1, 1), :] = zero_col
    pad_ref[pl.ds(1, H2), pl.ds(1, W2), :] = pooled

    # ---- im2col: pay the shifted copies once (9 VMEM->VMEM slab writes).
    #      Further micro-opt (not done): handle the dx shifts with pltpu.roll
    #      on the XLU instead of sublane-misaligned slices.
    for tap in range(9):
        dy, dx = tap // 3, tap % 3
        slab_ref[:, :, pl.ds(tap * Cin, Cin)] = \
            pad_ref[pl.ds(dy, H2), pl.ds(dx, W2), :]

    # ---- Single MXU matmul (bf16 x bf16 -> f32 acc); bias + ReLU fused into
    #      the lane-dense output store.
    patches = slab_ref[...].reshape(H2 * W2, 9 * Cin)
    acc = jnp.dot(patches, w_ref[...], preferred_element_type=jnp.float32)
    o_ref[0] = jnp.maximum(acc + b_ref[...], 0.0)


# ----------------------------------------------------------------------------
# VMEM budgeting / Cout tiling helpers
# ----------------------------------------------------------------------------
def _vmem_capacity_bytes():
    try:
        return int(pltpu.get_tpu_info().vmem_capacity_bytes)
    except Exception:
        return 64 << 20  # conservative default (v7x per-core VMEM)


def _block_footprint_bytes(H2, W2, Cin, tc, wb_bufs):
    bf16, f32 = 2, 4
    x_blk = H2 * (2 * W2) * (2 * Cin) * bf16        # input block
    w_blk = 9 * Cin * tc * bf16                     # weight block
    b_blk = tc * f32                                # bias block
    o_blk = H2 * W2 * tc * f32                      # output block
    pad_s = (H2 + 2) * (W2 + 2) * Cin * bf16        # padded pooled scratch
    slab_s = H2 * W2 * 9 * Cin * bf16               # im2col slab scratch
    return 2 * x_blk + wb_bufs * (w_blk + b_blk) + 2 * o_blk + pad_s + slab_s


def _choose_cout_tile(cout_pad, H2, W2, Cin, budget):
    """Largest multiple-of-128 divisor of cout_pad whose block footprint fits."""
    cands = sorted((d for d in range(128, cout_pad + 1, 128) if cout_pad % d == 0),
                   reverse=True)
    for tc in cands:
        wb = 1 if tc == cout_pad else 2
        if _block_footprint_bytes(H2, W2, Cin, tc, wb) <= budget:
            return tc
    # TODO(synk): very large H2*W2*Cin blocks would additionally need H row-band tiling.
    return cands[-1]


# ----------------------------------------------------------------------------
# Wrappers
# ----------------------------------------------------------------------------
def bridge_down_nhwc(x_nhwc, weight, bias):
    """x_nhwc: (N, H, W, Cin); weight: (Cout, Cin, 3, 3); bias: (Cout,).
    Returns NHWC output (N, H/2, W/2, Cout) f32."""
    N, H, W, Cin = x_nhwc.shape
    Cout = weight.shape[0]
    # TODO(synk): odd H/W (MaxPool2d floor mode) not handled; UNet sizes are even.
    assert H % 2 == 0 and W % 2 == 0, "spatial dims must be even"
    H2, W2 = H // 2, W // 2

    # Lane-dense output: pad Cout up to a multiple of 128 (unmasked stores).
    Cout_pad = max(128, ((Cout + 127) // 128) * 128)

    # Layout glue only (XLA, fused with the bf16 cast): fold the 2x2 pooling
    # pair structure into the last two dims (free row-major reinterpretation).
    x_k = x_nhwc.reshape(N, H2, 2 * W2, 2 * Cin).astype(jnp.bfloat16)
    w_k = jnp.transpose(weight, (2, 3, 1, 0)).reshape(9 * Cin, Cout)
    w_k = jnp.pad(w_k, ((0, 0), (0, Cout_pad - Cout))).astype(jnp.bfloat16)
    b_k = jnp.pad(bias, (0, Cout_pad - Cout)).reshape(1, Cout_pad).astype(jnp.float32)

    # Size the Cout tile and the scoped-VMEM limit from the actual footprint.
    vmem_cap = _vmem_capacity_bytes()
    budget = (3 * vmem_cap) // 4
    tc = _choose_cout_tile(Cout_pad, H2, W2, Cin, budget)
    n_ct = Cout_pad // tc
    wb_bufs = 1 if n_ct == 1 else 2
    fp = _block_footprint_bytes(H2, W2, Cin, tc, wb_bufs)
    vmem_limit = fp + max(fp // 2, 8 << 20)          # headroom for compiler temps
    vmem_limit = max(vmem_limit, 32 << 20)
    vmem_limit = min(vmem_limit, vmem_cap - (4 << 20))
    vmem_limit = max(vmem_limit, fp + (2 << 20))

    # Weight/bias blocks never change when there is a single Cout tile:
    # keep them single-buffered to save VMEM.
    pm = dict(pipeline_mode=pl.Buffered(1)) if n_ct == 1 else {}

    out = pl.pallas_call(
        bridge_down_kernel,
        out_shape=jax.ShapeDtypeStruct((N, H2 * W2, Cout_pad), jnp.float32),
        grid_spec=pltpu.PrefetchScalarGridSpec(
            num_scalar_prefetch=0,
            grid=(N, n_ct),
            in_specs=[
                pl.BlockSpec((1, H2, 2 * W2, 2 * Cin), lambda n, c: (n, 0, 0, 0)),
                pl.BlockSpec((9 * Cin, tc), lambda n, c: (0, c), **pm),
                pl.BlockSpec((1, tc), lambda n, c: (0, c), **pm),
            ],
            out_specs=pl.BlockSpec((1, H2 * W2, tc), lambda n, c: (n, 0, c)),
            scratch_shapes=[
                pltpu.VMEM((H2 + 2, W2 + 2, Cin), jnp.bfloat16),   # padded pooled map
                pltpu.VMEM((H2, W2, 9 * Cin), jnp.bfloat16),       # im2col slab
            ],
        ),
        compiler_params=pltpu.CompilerParams(
            dimension_semantics=("parallel", "parallel"),
            vmem_limit_bytes=int(vmem_limit),
        ),
    )(x_k, w_k, b_k)

    # Drop the lane padding; reshape back to spatial NHWC.
    return out.reshape(N, H2, W2, Cout_pad)[..., :Cout]


def bridge_down(x, weight, bias):
    """NCHW interface matching the PyTorch module.
    x: (N, Cin, H, W) f32; weight: (Cout, Cin, 3, 3); bias: (Cout,)."""
    # TODO(synk): keep the surrounding UNet in NHWC to eliminate these two
    # full HBM transpose passes (use bridge_down_nhwc directly).
    x_nhwc = jnp.transpose(x, (0, 2, 3, 1))
    out_nhwc = bridge_down_nhwc(x_nhwc, weight, bias)
    return jnp.transpose(out_nhwc, (0, 3, 1, 2))


def bridge_down_ref(x, weight, bias):
    """Pure-JAX reference mirroring the PyTorch forward."""
    pooled = jax.lax.reduce_window(
        x, -jnp.inf, jax.lax.max,
        window_dimensions=(1, 1, 2, 2), window_strides=(1, 1, 2, 2),
        padding="VALID")
    out = jax.lax.conv_general_dilated(
        pooled, weight, window_strides=(1, 1), padding=((1, 1), (1, 1)),
        dimension_numbers=("NCHW", "OIHW", "NCHW"),
        precision=jax.lax.Precision.HIGHEST)
    return jnp.maximum(out + bias[None, :, None, None], 0.0)


if __name__ == "__main__":
    key = jax.random.PRNGKey(0)
    kx, kw, kb = jax.random.split(key, 3)

    N, Cin, Cout, H, W = 2, 4, 8, 16, 16
    x = jax.random.normal(kx, (N, Cin, H, W), jnp.float32)
    weight = 0.1 * jax.random.normal(kw, (Cout, Cin, 3, 3), jnp.float32)
    bias = 0.1 * jax.random.normal(kb, (Cout,), jnp.float32)

    out = jax.block_until_ready(bridge_down(x, weight, bias))
    ref = bridge_down_ref(x, weight, bias)
    assert out.shape == ref.shape == (N, Cout, H // 2, W // 2)

    # Tolerance covers bf16 operand quantization (MXU accumulates in f32);
    # structural bugs produce O(0.1+) errors and are still caught.
    max_diff = float(jnp.max(jnp.abs(out - ref)))
    assert jnp.allclose(out, ref, rtol=2e-2, atol=3e-2), f"mismatch: {max_diff}"

    print("KERNEL_OK")
</pallas_src>

<mosaic_0001>
module attributes {stable_mosaic.version = 11 : i64} {
  func.func @bridge_down_kernel(%arg0: i32, %arg1: i32, %arg2: memref<1x8x16x8xbf16, #tpu.memory_space<vmem>>, %arg3: memref<36x128xbf16, #tpu.memory_space<vmem>>, %arg4: memref<1x128xf32, #tpu.memory_space<vmem>>, %arg5: memref<1x64x128xf32, #tpu.memory_space<vmem>>, %arg6: memref<10x10x4xbf16, #tpu.memory_space<vmem>>, %arg7: memref<8x8x36xbf16, #tpu.memory_space<vmem>>) attributes {dimension_semantics = [#tpu.dimension_semantics<parallel>, #tpu.dimension_semantics<parallel>], iteration_bounds = array<i64: 2, 1>, scalar_prefetch = 0 : i64, scratch_operands = 2 : i64, tpu.core_type = #tpu.core_type<tc>, window_params = [{transform_indices = @transform_0, window_bounds = array<i64: 1, 8, 16, 8>}, {pipeline_mode = #tpu.pipeline_mode<synchronous>, transform_indices = @transform_1, window_bounds = array<i64: 36, 128>}, {pipeline_mode = #tpu.pipeline_mode<synchronous>, transform_indices = @transform_2, window_bounds = array<i64: 1, 128>}, {transform_indices = @transform_3, window_bounds = array<i64: 1, 64, 128>}]} {
    %c0 = arith.constant 0 : index
    %c0_0 = arith.constant 0 : index
    %c0_1 = arith.constant 0 : index
    %c0_2 = arith.constant 0 : index
    %0 = vector.load %arg2[%c0, %c0_0, %c0_1, %c0_2] : memref<1x8x16x8xbf16, #tpu.memory_space<vmem>>, vector<1x8x16x8xbf16>
    %1 = vector.shape_cast %0 : vector<1x8x16x8xbf16> to vector<8x16x8xbf16>
    %2 = vector.extract_strided_slice %1 {offsets = [0, 0, 0], sizes = [8, 8, 8], strides = [1, 1, 1]} : vector<8x16x8xbf16> to vector<8x8x8xbf16>
    %3 = vector.extract_strided_slice %1 {offsets = [0, 8, 0], sizes = [8, 8, 8], strides = [1, 1, 1]} : vector<8x16x8xbf16> to vector<8x8x8xbf16>
    %4 = arith.maximumf %2, %3 : vector<8x8x8xbf16>
    %5 = vector.extract_strided_slice %4 {offsets = [0, 0, 0], sizes = [8, 8, 4], strides = [1, 1, 1]} : vector<8x8x8xbf16> to vector<8x8x4xbf16>
    %6 = vector.extract_strided_slice %4 {offsets = [0, 0, 4], sizes = [8, 8, 4], strides = [1, 1, 1]} : vector<8x8x8xbf16> to vector<8x8x4xbf16>
    %7 = arith.maximumf %5, %6 : vector<8x8x4xbf16>
    %cst = arith.constant 0.000000e+00 : bf16
    %8 = vector.broadcast %cst : bf16 to vector<1x10x4xbf16>
    %cst_3 = arith.constant 0.000000e+00 : bf16
    %9 = vector.broadcast %cst_3 : bf16 to vector<8x1x4xbf16>
    %c0_4 = arith.constant 0 : index
    %c0_5 = arith.constant 0 : index
    %c0_6 = arith.constant 0 : index
    %10 = vector.load %arg6[%c0_4, %c0_5, %c0_6] : memref<10x10x4xbf16, #tpu.memory_space<vmem>>, vector<1x10x4xbf16>
    tpu.vector_store %arg6[%c0_4, %c0_5, %c0_6], %8 {strides = array<i32>} : memref<10x10x4xbf16, #tpu.memory_space<vmem>>, vector<1x10x4xbf16>,
    %c9 = arith.constant 9 : index
    %c0_7 = arith.constant 0 : index
    %c0_8 = arith.constant 0 : index
    %11 = vector.load %arg6[%c9, %c0_7, %c0_8] : memref<10x10x4xbf16, #tpu.memory_space<vmem>>, vector<1x10x4xbf16>
    tpu.vector_store %arg6[%c9, %c0_7, %c0_8], %8 {strides = array<i32>} : memref<10x10x4xbf16, #tpu.memory_space<vmem>>, vector<1x10x4xbf16>,
    %c1 = arith.constant 1 : index
    %c0_9 = arith.constant 0 : index
    %c0_10 = arith.constant 0 : index
    %12 = vector.load %arg6[%c1, %c0_9, %c0_10] : memref<10x10x4xbf16, #tpu.memory_space<vmem>>, vector<8x1x4xbf16>
    tpu.vector_store %arg6[%c1, %c0_9, %c0_10], %9 {strides = array<i32>} : memref<10x10x4xbf16, #tpu.memory_space<vmem>>, vector<8x1x4xbf16>,
    %c1_11 = arith.constant 1 : index
    %c9_12 = arith.constant 9 : index
    %c0_13 = arith.constant 0 : index
    %13 = vector.load %arg6[%c1_11, %c9_12, %c0_13] : memref<10x10x4xbf16, #tpu.memory_space<vmem>>, vector<8x1x4xbf16>
    tpu.vector_store %arg6[%c1_11, %c9_12, %c0_13], %9 {strides = array<i32>} : memref<10x10x4xbf16, #tpu.memory_space<vmem>>, vector<8x1x4xbf16>,
    %c1_14 = arith.constant 1 : index
    %c1_15 = arith.constant 1 : index
    %c0_16 = arith.constant 0 : index
    %14 = vector.load %arg6[%c1_14, %c1_15, %c0_16] : memref<10x10x4xbf16, #tpu.memory_space<vmem>>, vector<8x8x4xbf16>
    tpu.vector_store %arg6[%c1_14, %c1_15, %c0_16], %7 {strides = array<i32>} : memref<10x10x4xbf16, #tpu.memory_space<vmem>>, vector<8x8x4xbf16>,
    %c0_17 = arith.constant 0 : index
    %c0_18 = arith.constant 0 : index
    %c0_19 = arith.constant 0 : index
    %15 = vector.load %arg6[%c0_17, %c0_18, %c0_19] : memref<10x10x4xbf16, #tpu.memory_space<vmem>>, vector<8x8x4xbf16>
    %c0_20 = arith.constant 0 : index
    %c0_21 = arith.constant 0 : index
    %c0_22 = arith.constant 0 : index
    %16 = vector.load %arg7[%c0_20, %c0_21, %c0_22] : memref<8x8x36xbf16, #tpu.memory_space<vmem>>, vector<8x8x4xbf16>
    tpu.vector_store %arg7[%c0_20, %c0_21, %c0_22], %15 {strides = array<i32>} : memref<8x8x36xbf16, #tpu.memory_space<vmem>>, vector<8x8x4xbf16>,
    %c0_23 = arith.constant 0 : index
    %c1_24 = arith.constant 1 : index
    %c0_25 = arith.constant 0 : index
    %17 = vector.load %arg6[%c0_23, %c1_24, %c0_25] : memref<10x10x4xbf16, #tpu.memory_space<vmem>>, vector<8x8x4xbf16>
    %c0_26 = arith.constant 0 : index
    %c0_27 = arith.constant 0 : index
    %c4 = arith.constant 4 : index
    %18 = vector.load %arg7[%c0_26, %c0_27, %c4] : memref<8x8x36xbf16, #tpu.memory_space<vmem>>, vector<8x8x4xbf16>
    tpu.vector_store %arg7[%c0_26, %c0_27, %c4], %17 {strides = array<i32>} : memref<8x8x36xbf16, #tpu.memory_space<vmem>>, vector<8x8x4xbf16>,
    %c0_28 = arith.constant 0 : index
    %c2 = arith.constant 2 : index
    %c0_29 = arith.constant 0 : index
    %19 = vector.load %arg6[%c0_28, %c2, %c0_29] : memref<10x10x4xbf16, #tpu.memory_space<vmem>>, vector<8x8x4xbf16>
    %c0_30 = arith.constant 0 : index
    %c0_31 = arith.constant 0 : index
    %c8 = arith.constant 8 : index
    %20 = vector.load %arg7[%c0_30, %c0_31, %c8] : memref<8x8x36xbf16, #tpu.memory_space<vmem>>, vector<8x8x4xbf16>
    tpu.vector_store %arg7[%c0_30, %c0_31, %c8], %19 {strides = array<i32>} : memref<8x8x36xbf16, #tpu.memory_space<vmem>>, vector<8x8x4xbf16>,
    %c1_32 = arith.constant 1 : index
    %c0_33 = arith.constant 0 : index
    %c0_34 = arith.constant 0 : index
    %21 = vector.load %arg6[%c1_32, %c0_33, %c0_34] : memref<10x10x4xbf16, #tpu.memory_space<vmem>>, vector<8x8x4xbf16>
    %c0_35 = arith.constant 0 : index
    %c0_36 = arith.constant 0 : index
    %c12 = arith.constant 12 : index
    %22 = vector.load %arg7[%c0_35, %c0_36, %c12] : memref<8x8x36xbf16, #tpu.memory_space<vmem>>, vector<8x8x4xbf16>
    tpu.vector_store %arg7[%c0_35, %c0_36, %c12], %21 {strides = array<i32>} : memref<8x8x36xbf16, #tpu.memory_space<vmem>>, vector<8x8x4xbf16>,
    %c1_37 = arith.constant 1 : index
    %c1_38 = arith.constant 1 : index
    %c0_39 = arith.constant 0 : index
    %23 = vector.load %arg6[%c1_37, %c1_38, %c0_39] : memref<10x10x4xbf16, #tpu.memory_space<vmem>>, vector<8x8x4xbf16>
    %c0_40 = arith.constant 0 : index
    %c0_41 = arith.constant 0 : index
    %c16 = arith.constant 16 : index
    %24 = vector.load %arg7[%c0_40, %c0_41, %c16] : memref<8x8x36xbf16, #tpu.memory_space<vmem>>, vector<8x8x4xbf16>
    tpu.vector_store %arg7[%c0_40, %c0_41, %c16], %23 {strides = array<i32>} : memref<8x8x36xbf16, #tpu.memory_space<vmem>>, vector<8x8x4xbf16>,
    %c1_42 = arith.constant 1 : index
    %c2_43 = arith.constant 2 : index
    %c0_44 = arith.constant 0 : index
    %25 = vector.load %arg6[%c1_42, %c2_43, %c0_44] : memref<10x10x4xbf16, #tpu.memory_space<vmem>>, vector<8x8x4xbf16>
    %c0_45 = arith.constant 0 : index
    %c0_46 = arith.constant 0 : index
    %c20 = arith.constant 20 : index
    %26 = vector.load %arg7[%c0_45, %c0_46, %c20] : memref<8x8x36xbf16, #tpu.memory_space<vmem>>, vector<8x8x4xbf16>
    tpu.vector_store %arg7[%c0_45, %c0_46, %c20], %25 {strides = array<i32>} : memref<8x8x36xbf16, #tpu.memory_space<vmem>>, vector<8x8x4xbf16>,
    %c2_47 = arith.constant 2 : index
    %c0_48 = arith.constant 0 : index
    %c0_49 = arith.constant 0 : index
    %27 = vector.load %arg6[%c2_47, %c0_48, %c0_49] : memref<10x10x4xbf16, #tpu.memory_space<vmem>>, vector<8x8x4xbf16>
    %c0_50 = arith.constant 0 : index
    %c0_51 = arith.constant 0 : index
    %c24 = arith.constant 24 : index
    %28 = vector.load %arg7[%c0_50, %c0_51, %c24] : memref<8x8x36xbf16, #tpu.memory_space<vmem>>, vector<8x8x4xbf16>
    tpu.vector_store %arg7[%c0_50, %c0_51, %c24], %27 {strides = array<i32>} : memref<8x8x36xbf16, #tpu.memory_space<vmem>>, vector<8x8x4xbf16>,
    %c2_52 = arith.constant 2 : index
    %c1_53 = arith.constant 1 : index
    %c0_54 = arith.constant 0 : index
    %29 = vector.load %arg6[%c2_52, %c1_53, %c0_54] : memref<10x10x4xbf16, #tpu.memory_space<vmem>>, vector<8x8x4xbf16>
    %c0_55 = arith.constant 0 : index
    %c0_56 = arith.constant 0 : index
    %c28 = arith.constant 28 : index
    %30 = vector.load %arg7[%c0_55, %c0_56, %c28] : memref<8x8x36xbf16, #tpu.memory_space<vmem>>, vector<8x8x4xbf16>
    tpu.vector_store %arg7[%c0_55, %c0_56, %c28], %29 {strides = array<i32>} : memref<8x8x36xbf16, #tpu.memory_space<vmem>>, vector<8x8x4xbf16>,
    %c2_57 = arith.constant 2 : index
    %c2_58 = arith.constant 2 : index
    %c0_59 = arith.constant 0 : index
    %31 = vector.load %arg6[%c2_57, %c2_58, %c0_59] : memref<10x10x4xbf16, #tpu.memory_space<vmem>>, vector<8x8x4xbf16>
    %c0_60 = arith.constant 0 : index
    %c0_61 = arith.constant 0 : index
    %c32 = arith.constant 32 : index
    %32 = vector.load %arg7[%c0_60, %c0_61, %c32] : memref<8x8x36xbf16, #tpu.memory_space<vmem>>, vector<8x8x4xbf16>
    tpu.vector_store %arg7[%c0_60, %c0_61, %c32], %31 {strides = array<i32>} : memref<8x8x36xbf16, #tpu.memory_space<vmem>>, vector<8x8x4xbf16>,
    %c0_62 = arith.constant 0 : index
    %c0_63 = arith.constant 0 : index
    %c0_64 = arith.constant 0 : index
    %33 = vector.load %arg7[%c0_62, %c0_63, %c0_64] : memref<8x8x36xbf16, #tpu.memory_space<vmem>>, vector<8x8x36xbf16>
    %34 = vector.shape_cast %33 : vector<8x8x36xbf16> to vector<64x36xbf16>
    %c0_65 = arith.constant 0 : index
    %c0_66 = arith.constant 0 : index
    %35 = vector.load %arg3[%c0_65, %c0_66] : memref<36x128xbf16, #tpu.memory_space<vmem>>, vector<36x128xbf16>
    %cst_67 = arith.constant dense<0.000000e+00> : vector<64x128xf32>
    %36 = tpu.matmul %34, %35, %cst_67 {dimension_numbers = #tpu.dot_dimension_numbers<[1], [0], [0], [1], [0, 0, 1, 1], [], []>} : vector<64x36xbf16>, vector<36x128xbf16>, vector<64x128xf32> -> vector<64x128xf32>
    %c0_68 = arith.constant 0 : index
    %c0_69 = arith.constant 0 : index
    %37 = vector.load %arg4[%c0_68, %c0_69] : memref<1x128xf32, #tpu.memory_space<vmem>>, vector<1x128xf32>
    %38 = vector.broadcast %37 : vector<1x128xf32> to vector<64x128xf32>
    %39 = arith.addf %36, %38 : vector<64x128xf32>
    %cst_70 = arith.constant 0.000000e+00 : f32
    %40 = vector.broadcast %cst_70 : f32 to vector<64x128xf32>
    %41 = arith.maximumf %39, %40 : vector<64x128xf32>
    %c0_71 = arith.constant 0 : index
    %c0_72 = arith.constant 0 : index
    %c0_73 = arith.constant 0 : index
    %42 = vector.load %arg5[%c0_71, %c0_72, %c0_73] : memref<1x64x128xf32, #tpu.memory_space<vmem>>, vector<1x64x128xf32>
    %43 = vector.shape_cast %42 : vector<1x64x128xf32> to vector<64x128xf32>
    %44 = vector.shape_cast %41 : vector<64x128xf32> to vector<1x64x128xf32>
    tpu.vector_store %arg5[%c0_71, %c0_72, %c0_73], %44 {strides = array<i32>} : memref<1x64x128xf32, #tpu.memory_space<vmem>>, vector<1x64x128xf32>,
    return
  }
  func.func @transform_0(%arg0: i32, %arg1: i32) -> (i32, i32, i32, i32) {
    %c0_i32 = arith.constant 0 : i32
    %c0_i32_0 = arith.constant 0 : i32
    %c0_i32_1 = arith.constant 0 : i32
    %c0_i32_2 = arith.constant 0 : i32
    return %arg0, %c0_i32, %c0_i32_0, %c0_i32_1 : i32, i32, i32, i32
  }
  func.func @transform_1(%arg0: i32, %arg1: i32) -> (i32, i32) {
    %c0_i32 = arith.constant 0 : i32
    %c0_i32_0 = arith.constant 0 : i32
    return %c0_i32, %arg1 : i32, i32
  }
  func.func @transform_2(%arg0: i32, %arg1: i32) -> (i32, i32) {
    %c0_i32 = arith.constant 0 : i32
    %c0_i32_0 = arith.constant 0 : i32
    return %c0_i32, %arg1 : i32, i32
  }
  func.func @transform_3(%arg0: i32, %arg1: i32) -> (i32, i32, i32) {
    %c0_i32 = arith.constant 0 : i32
    %c0_i32_0 = arith.constant 0 : i32
    return %arg0, %c0_i32, %arg1 : i32, i32, i32
  }
}

</mosaic_0001>

<bundles_post_ra>
// kernel: tpu_custom_call.1
= control target key start
LH: loop header
LB: loop body
LE: loop exit
PB: predicated region body
PF: predicated region fallthrough
CT: control target
= control target key end

     0   :  { %8 = vsyncpa [#allocation5], 0  ;;  %s2527_s0 = inlined_call_operand.vmem [shape: bf16[2,8,16,8], index: 0, kind: input, shape index: {}]   ;;  %s2528_s1 = inlined_call_operand.vmem [shape: bf16[36,128], index: 1, kind: input, shape index: {}]   ;;  %s2529_s2 = inlined_call_operand.vmem [shape: f32[1,128], index: 2, kind: input, shape index: {}]   ;;  %s2530_s3 = inlined_call_operand.hbm [shape: f32[2,64,128], index: 3, kind: output, shape index: {}]  }
   0x1   :  { %10 = vsyncpa [#allocation5 + $0x1], 0  ;;  %s1897_s12 = smov 0   ;;  %s1899_s13 = smov 0  }
   0x2   :  { %s1901_s14 = smov 0   ;;  %s1903_s15 = smov 0  }
   0x3   :  { %s1905_s16 = smov 0   ;;  %s1907_s17 = smov 0  }
   0x4 LB: > { %s1632_s18 = sadd.s32 4294967295, %s1863_s17   ;;  %s1633_s19 = sadd.s32 4294967294, %s1863_s17   ;;  %s1863_s17 = sphi %s1907_s17, %s16_s17   ;;  %s1859_s16 = sphi %s1905_s16, %s2547_s16   ;;  %s1855_s15 = sphi %s1903_s15, %s2546_s15   ;;  %s1851_s14 = sphi %s1901_s14, %s2545_s14   ;;  %s1847_s13 = sphi %s1899_s13, %s2544_s13   ;;  %s1843_s12 = sphi %s1897_s12, %s2543_s12  }
   0x5   : > { %s28_s20 = sadd.s32 1, %s1859_s16  ;;  %s115_s21 = sadd.s32 1, %s1851_s14 }
   0x6   : > { %p30_p0 = scmp.ge.s32.totalorder %s28_s20, 2  ;;  %p125_p1 = scmp.ne.s32.totalorder %s1851_s14, %s1847_s13 }
   0x7   : > { %p126_p2 = scmp.eq.s32.totalorder %s1632_s18, 1  ;;  %p131_p3 = scmp.ne.s32.totalorder %s1847_s13, %s1843_s12 }
   0x8   : > { %s2549_s20 = smov (%p30_p0, %s28_s20), 0  ;;  %p132_p5 = scmp.eq.s32.totalorder %s1633_s19, 1 }
   0x9   : > { %p1937_p4 = por %p126_p2, %p125_p1  ;;  %s110_s23 = ssub.s32 %s1859_s16, %s2549_s20 }
   0xa   : > { %p1638_p6 = scmp.ge.s32.totalorder %s1863_s17, 1  ;;  %p113_p7 = scmp.eq.s32.totalorder %s110_s23, 0 }
   0xb   : > { %p1944_p8 = por %p132_p5, %p131_p3  ;;  %p171_p9 = scmp.lt.s32.totalorder %s1863_s17, 3 }
   0xc   : > { %s1950_s25 = scalar_select %p113_p7, %s1851_s14, %s115_s21  }
   0xd   : > { %p172_p10 = pnand %p1638_p6, %p171_p9 }
   0xe   : > { %p202_p11 = scmp.lt.s32.totalorder (!%p172_p10), %s1855_s15, 1  ;;  %s1866_s4 = smov (!%p172_p10), 124  }
   0xf   : > { %175 = sbr.rel (%p172_p10) target bundleno = 623 (0x26f), region = 32  ;;  %s1867_s5 = smov (!%p172_p10), 24  }
  0x10   : > { %s1868_s6 = smov (!%p172_p10), 4   ;;  %s1869_s7 = smov (!%p172_p10), 8  }
  0x11   : > { %s1870_s8 = smov (!%p172_p10), 28   ;;  %s1871_s9 = smov (!%p172_p10), 12  }
  0x12   : > { %s1872_s10 = smov (!%p172_p10), 20   ;;  %s1873_s11 = smov (!%p172_p10), 32  }
  0x13   : > { %s1874_s18 = smov (!%p172_p10), 16   ;;  %s199_s29 = sand.u32 (!%p172_p10), 1, %s1847_s13  }
  0x14   : > { %vm279_vm0 = vcmask 27648   ;;  %vm281_vm1 = vcmask 24576   ;;  %v1865_v0 = vmov 0   ;;  %vm288_vm2 = vsmask.f32 256  ;;  %s203_s26 = scalar_select %p202_p11, %s1855_s15, 1 }
  0x15   : > { %282 = vst.msk [vmem:[#allocation2 + $0x4] sm:$0x1] %vm281_vm1, %v1865_v0  ;;  %285 = vst.msk [vmem:[#allocation2 + $0x4c] sm:$0x1] %vm281_vm1, %v1865_v0  ;;  %v302_v1 = vld [vmem:[#allocation2 + $0x28] sm:$0x1] }
  0x16   : > { %vm314_vm3 = vsmask.f32 7938  ;;  %280 = vst.msk [vmem:[#allocation2] sm:$0xf] %vm279_vm0, %v1865_v0  ;;  %284 = vst.msk [vmem:[#allocation2 + $0x48] sm:$0xf] %vm279_vm0, %v1865_v0 }
  0x17   : > { %vm1956_vm4 = vmand %vm281_vm1, %vm288_vm2  ;;  %v328_v3 = vld [vmem:[#allocation2 + $0x2c] sm:$0x1]  ;;  %v290_v4 = vld [vmem:[#allocation2 + $0x8] sm:$0x1]  ;;  %s1683_s27 = sshll.u32 %s203_s26, 6  ;;  %vm682_vm8 = vcmask 1042432  }
  0x18   : > { %v303_v5 = vsel %vm1956_vm4, 0, %v302_v1  ;;  %vm1963_vm5 = vmand %vm281_vm1, %vm314_vm3  ;;  %v291_v7 = vsel %vm1956_vm4, 0, %v290_v4  ;;  %v316_v8 = vld [vmem:[#allocation2 + $0xc] sm:$0x1]  ;;  %v293_v9 = vld [vmem:[#allocation2 + $0x10] sm:$0x1]  ;;  %s1978_s30 = scalar_lea.vmem %s2527_s0, %s1683_s27 }
  0x19   : > { %304 = vst [vmem:[#allocation2 + $0x28] sm:$0x1] %v303_v5  ;;  %v329_v10 = vsel %vm1963_vm5, 0, %v328_v3  ;;  %292 = vst [vmem:[#allocation2 + $0x8] sm:$0x1] %v291_v7  ;;  %v317_v11 = vsel %vm1963_vm5, 0, %v316_v8 }
  0x1a   : > { %v294_v12 = vsel %vm1956_vm4, 0, %v293_v9  ;;  %v319_v13 = vld [vmem:[#allocation2 + $0x14] sm:$0x1]  ;;  %330 = vst [vmem:[#allocation2 + $0x2c] sm:$0x1] %v329_v10  ;;  %vm683_vm10 = vcmask 1046532   ;;  %vm2076_vm12 = vmand %vm279_vm0, %vm314_vm3 }
  0x1b   : > { %318 = vst [vmem:[#allocation2 + $0xc] sm:$0x1] %v317_v11  ;;  %295 = vst [vmem:[#allocation2 + $0x10] sm:$0x1] %v294_v12  ;;  %v320_v14 = vsel %vm1963_vm5, 0, %v319_v13  ;;  %vm641_vm13 = vcmask 60448  }
  0x1c   : > { %v223_v15 = vld [vmem:[%s1978_s30 + $0x20] sm:$0xf]  ;;  %v224_v16 = vld [vmem:[%s1978_s30 + $0x24] sm:$0xf]  ;;  %321 = vst [vmem:[#allocation2 + $0x14] sm:$0x1] %v320_v14  ;;  %vm2056_vm11 = vmor %vm682_vm8, %vm683_vm10 }
  0x1d   : > { %v215_v17 = vld [vmem:[%s1978_s30] sm:$0xf]  ;;  %v1985_v18 = vmax.bf16 %v224_v16, %v223_v15  ;;  %v216_v19 = vld [vmem:[%s1978_s30 + $0x4] sm:$0xf]  ;;  %v217_v20 = vld [vmem:[%s1978_s30 + $0x8] sm:$0xf] }
  0x1e   : > { %v218_v21 = vld [vmem:[%s1978_s30 + $0xc] sm:$0xf]  ;;  %v1990_v22 = vmax.bf16 %v216_v19, %v215_v17  ;;  %v221_v23 = vld [vmem:[%s1978_s30 + $0x18] sm:$0xf]  ;;  %v222_v24 = vld [vmem:[%s1978_s30 + $0x1c] sm:$0xf] }
  0x1f   : > { %255 = vrot.lane.b32.xlu1 %v1985_v18, %s1866_s4  ;;  %v1996_v25 = vmax.bf16 %v218_v21, %v217_v20  ;;  %v299_v26 = vld [vmem:[#allocation2 + $0x20] sm:$0x1]  ;;  %v2000_v27 = vmax.bf16 %v222_v24, %v221_v23  ;;  %v225_v28 = vld [vmem:[%s1978_s30 + $0x28] sm:$0xf]  ;;  %v226_v29 = vld [vmem:[%s1978_s30 + $0x2c] sm:$0xf] }
  0x20   : > { %247 = vrot.lane.b32.xlu0 %v1990_v22, %s1866_s4  ;;  %v325_v30 = vld [vmem:[#allocation2 + $0x24] sm:$0x1]  ;;  %v219_v31 = vld [vmem:[%s1978_s30 + $0x10] sm:$0xf]  ;;  %v220_v32 = vld [vmem:[%s1978_s30 + $0x14] sm:$0xf]  ;;  %v2010_v35 = vmax.bf16 %v226_v29, %v225_v28 }
  0x21   : > { %v229_v33 = vld [vmem:[%s1978_s30 + $0x38] sm:$0xf]  ;;  %v230_v34 = vld [vmem:[%s1978_s30 + $0x3c] sm:$0xf]  ;;  %v227_v36 = vld [vmem:[%s1978_s30 + $0x30] sm:$0xf]  ;;  %v2020_v41 = vmax.bf16 %v220_v32, %v219_v31 }
  0x22   : > { %v228_v37 = vld [vmem:[%s1978_s30 + $0x34] sm:$0xf]  ;;  %v300_v38 = vsel %vm1956_vm4, 0, %v299_v26  ;;  %v326_v39 = vsel %vm1963_vm5, 0, %v325_v30  ;;  %v305_v40 = vld [vmem:[#allocation2 + $0x30] sm:$0x1]  ;;  %v2032_v52 = vmax.bf16 %v230_v34, %v229_v33 }
  0x23   : > { %249 = vrot.lane.b32.xlu1 %v1996_v25, %s1866_s4  ;;  %301 = vst [vmem:[#allocation2 + $0x20] sm:$0x1] %v300_v38  ;;  %327 = vst [vmem:[#allocation2 + $0x24] sm:$0x1] %v326_v39  ;;  %v306_v42 = vsel %vm1956_vm4, 0, %v305_v40  ;;  %v2036_v56 = vmax.bf16 %v228_v37, %v227_v36  ;;  %vm741_vm14 = vcmask 93248  }
  0x24   : > { %253 = vrot.lane.b32.xlu0 %v2000_v27, %s1866_s4  ;;  %v331_v43 = vld [vmem:[#allocation2 + $0x34] sm:$0x1]  ;;  %v296_v44 = vld [vmem:[#allocation2 + $0x18] sm:$0x1]  ;;  %307 = vst [vmem:[#allocation2 + $0x30] sm:$0x1] %v306_v42 }
  0x25   : > { %v332_v45 = vsel %vm1963_vm5, 0, %v331_v43  ;;  %v297_v46 = vsel %vm1956_vm4, 0, %v296_v44  ;;  %v322_v47 = vld [vmem:[#allocation2 + $0x1c] sm:$0x1]  ;;  %v486_v48 = vld [vmem:[#allocation2] sm:$0xf] }
  0x26   : > { %333 = vst [vmem:[#allocation2 + $0x34] sm:$0x1] %v332_v45  ;;  %298 = vst [vmem:[#allocation2 + $0x18] sm:$0x1] %v297_v46  ;;  %v323_v49 = vsel %vm1963_vm5, 0, %v322_v47  ;;  %v506_v51 = vshrl.u32 %v486_v48, 16 }
  0x27   : > { %v487_v50 = vld [vmem:[#allocation2 + $0x4] sm:$0x1]  ;;  %vm502_vm6 = vsmask.f32 3328  ;;  %257 = vrot.lane.b32.xlu1 %v2010_v35, %s1866_s4  ;;  %324 = vst [vmem:[#allocation2 + $0x1c] sm:$0x1] %v323_v49 }
  0x28   : > { %vm503_vm7 = vsmask.f32 7440  ;;  %v509_v53 = vshll.u32 %v486_v48, 16  ;;  %v515_v54 = vshll.u32 %v487_v50, 16  ;;  %v311_v55 = vld [vmem:[#allocation2 + $0x40] sm:$0x1]  ;;  %251 = vrot.lane.b32.xlu0 %v2020_v41, %s1866_s4 }
  0x29   : > { %v508_v57 = vrot.slane %v506_v51, 4  ;;  %v312_v58 = vsel %vm1956_vm4, 0, %v311_v55  ;;  %v337_v59 = vld [vmem:[#allocation2 + $0x44] sm:$0x1]  ;;  %v308_v60 = vld [vmem:[#allocation2 + $0x38] sm:$0x1]  ;;  %vm2052_vm9 = vmor %vm502_vm6, %vm503_vm7 }
  0x2a   : > { %v511_v61 = vrot.slane %v509_v53, 5  ;;  %313 = vst [vmem:[#allocation2 + $0x40] sm:$0x1] %v312_v58  ;;  %v338_v62 = vsel %vm1963_vm5, 0, %v337_v59  ;;  %v309_v63 = vsel %vm1956_vm4, 0, %v308_v60  ;;  %v517_v5 = vrot.slane %v515_v54, 5 }
  0x2b   : > { %v334_v0 = vld [vmem:[#allocation2 + $0x3c] sm:$0x1]  ;;  %339 = vst [vmem:[#allocation2 + $0x44] sm:$0x1] %v338_v62  ;;  %310 = vst [vmem:[#allocation2 + $0x38] sm:$0x1] %v309_v63  ;;  %261 = vrot.lane.b32.xlu1 %v2032_v52, %s1866_s4 }
  0x2c   : > { %v335_v1 = vsel %vm1963_vm5, 0, %v334_v0  ;;  %v650_v3 = vld [vmem:[#allocation2] sm:$0xe]  ;;  %v512_v4 = vor.u32 %v511_v61, %v508_v57  ;;  %v651_v7 = vld [vmem:[#allocation2 + $0x4] sm:$0x1]  ;;  %259 = vrot.lane.b32.xlu0 %v2036_v56, %s1866_s4  ;;  %vm1433_vm15 = vcmask 1041408  }
  0x2d   : > { %336 = vst [vmem:[#allocation2 + $0x3c] sm:$0x1] %v335_v1  ;;  %v1065_v6 = vld [vmem:[#allocation2 + $0x48] sm:$0xf]  ;;  %v1642_v10 = vrot.slane %v650_v3, 9  ;;  %v687_v11 = vrot.slane %v651_v7, 5 }
  0x2e   : > { %v513_v9 = vrot.slane %v512_v4, 4  ;;  %v1121_v13 = vld [vmem:[#allocation2 + $0x48] sm:$0xf]  ;;  %v1122_v14 = vld [vmem:[#allocation2 + $0x4c] sm:$0x1]  ;;  %vm951_vm1 = vcmask 158848  }
  0x2f   : > { %1088 = vrot.lane.b32.xlu1 %v1065_v6, %s1867_s5  ;;  %v1222_v16 = vshrl.u32 %v1121_v13, 16  ;;  %v1225_v17 = vshll.u32 %v1121_v13, 16  ;;  %v1231_v19 = vshll.u32 %v1122_v14, 16  ;;  %v688_v20 = vsel %vm2056_vm11, %v1642_v10, %v687_v11  ;;  %v470_v30 = vld [vmem:[#allocation2] sm:$0xf]  ;;  %s1875_s21 = smov [#allocation4]  }
  0x30   : > { %v518_v15 = vsel %vm2052_vm9, %v513_v9, %v517_v5  ;;  %478 = vst.msk [vmem:[#allocation3] sm:$0xf] %vm279_vm0, %v470_v30  ;;  %v446_v40 = vld [vmem:[#allocation2 + $0x28] sm:$0xf]  ;;  %v425_v51 = vld [vmem:[#allocation2 + $0xc] sm:$0x1] }
  0x31   : > { %617 = vrot.lane.b32.xlu0 %v518_v15, %s1868_s6  ;;  %v1224_v21 = vrot.slane %v1222_v16, 4  ;;  %v1227_v23 = vrot.slane %v1225_v17, 5  ;;  %v1233_v26 = vrot.slane %v1231_v19, 5  ;;  %v422_v47 = vld [vmem:[#allocation2 + $0x8] sm:$0xf]  ;;  %vm1048_vm2 = vcmask 191648  }
  0x32   : > { %v428_v62 = vld [vmem:[#allocation2 + $0x10] sm:$0xf]  ;;  %v431_v4 = vld [vmem:[#allocation2 + $0x14] sm:$0x1]  ;;  %v440_v5 = vld [vmem:[#allocation2 + $0x20] sm:$0xf] }
  0x33   : > { %v1228_v24 = vor.u32 %v1227_v23, %v1224_v21  ;;  %v443_v11 = vld [vmem:[#allocation2 + $0x24] sm:$0x1]  ;;  %v452_v23 = vld [vmem:[#allocation2 + $0x30] sm:$0xf]  ;;  %v455_v30 = vld [vmem:[#allocation2 + $0x34] sm:$0x1] }
  0x34   : > { %vm1098_vm3 = vcmask 224448   ;;  %vm1356_vm5 = vcmask 290048   ;;  %vm1420_vm6 = vcmask 293888   ;;  %s1791_s23 = sshll.u32 %s1875_s21, 4  ;;  %s1792_s23 = int_to_ptr.vmem [resolvable:$false] %s1791_s23 }
  0x35   : > { %717 = vrot.lane.b32.xlu0 %v688_v20, %s1869_s7  ;;  %v1229_v28 = vrot.slane %v1228_v24, 4  ;;  %s1793_s26 = scalar_lea.vmem %s1792_s23, 2048 }
  0x37   : > { %v1234_v29 = vsel %vm2052_vm9, %v1229_v28, %v1233_v26 }
  0x38   : > { %1249 = vrot.lane.b32.xlu1 %v1234_v29, %s1870_s8 }
  0x91   : > { %v256_v31 = vpop.permute.xlu1 %255 }
  0x92   : > { %v275_v32 = vmax.bf16 %v256_v31, %v1985_v18  ;;  %v248_v33 = vpop.permute.xlu0 %247  ;;  %v449_v18 = vld [vmem:[#allocation2 + $0x2c] sm:$0x1]  ;;  %v434_v31 = vld [vmem:[#allocation2 + $0x18] sm:$0xf] }
  0x93   : > { %v271_v34 = vmax.bf16 %v248_v33, %v1990_v22 }
  0x94   : > { %v373_v36 = vshrl.u32 %v275_v32, 16  ;;  %v376_v43 = vshll.u32 %v275_v32, 16 }
  0x95   : > { %v341_v37 = vshrl.u32 %v271_v34, 16  ;;  %v344_v38 = vshll.u32 %v271_v34, 16  ;;  %v250_v39 = vpop.permute.xlu1 %249 }
  0x96   : > { %v375_v42 = vrot.slane %v373_v36, 7  ;;  %v272_v44 = vmax.bf16 %v250_v39, %v1996_v25  ;;  %v254_v45 = vpop.permute.xlu0 %253 }
  0x97   : > { %v343_v48 = vrot.slane %v341_v37, 7  ;;  %v274_v22 = vmax.bf16 %v254_v45, %v2000_v27  ;;  %v437_v37 = vld [vmem:[#allocation2 + $0x1c] sm:$0x1] }
  0x98   : > { %v378_v49 = vor.u32 %v376_v43, %v375_v42  ;;  %v379_v50 = vrot.slane %v375_v42, 4  ;;  %v349_v53 = vshrl.u32 %v272_v44, 16  ;;  %v352_v54 = vshll.u32 %v272_v44, 16 }
  0x99   : > { %v346_v55 = vor.u32 %v344_v38, %v343_v48  ;;  %v347_v25 = vrot.slane %v343_v48, 4  ;;  %v365_v57 = vshrl.u32 %v274_v22, 16  ;;  %v368_v58 = vshll.u32 %v274_v22, 16  ;;  %v258_v59 = vpop.permute.xlu1 %257 }
  0x9a   : > { %v447_v60 = vsel %vm2076_vm12, %v378_v49, %v446_v40  ;;  %v450_v61 = vsel %vm1956_vm4, %v379_v50, %v449_v18  ;;  %v351_v63 = vrot.slane %v349_v53, 7  ;;  %v276_v27 = vmax.bf16 %v258_v59, %v2010_v35  ;;  %v252_v0 = vpop.permute.xlu0 %251  ;;  %v464_v18 = vld [vmem:[#allocation2 + $0x40] sm:$0xf]  ;;  %v467_v49 = vld [vmem:[#allocation2 + $0x44] sm:$0x1] }
  0x9b   : > { %448 = vst [vmem:[#allocation2 + $0x28] sm:$0xf] %v447_v60  ;;  %451 = vst [vmem:[#allocation2 + $0x2c] sm:$0x1] %v450_v61  ;;  %v423_v1 = vsel %vm2076_vm12, %v346_v55, %v422_v47  ;;  %v426_v3 = vsel %vm1956_vm4, %v347_v25, %v425_v51  ;;  %v367_v7 = vrot.slane %v365_v57, 7  ;;  %v273_v6 = vmax.bf16 %v252_v0, %v2020_v41 }
  0x9c   : > { %424 = vst [vmem:[#allocation2 + $0x8] sm:$0xf] %v423_v1  ;;  %427 = vst [vmem:[#allocation2 + $0xc] sm:$0x1] %v426_v3  ;;  %v354_v9 = vor.u32 %v352_v54, %v351_v63  ;;  %v355_v10 = vrot.slane %v351_v63, 4  ;;  %v381_v35 = vshrl.u32 %v276_v27, 16 }
  0x9d   : > { %v384_v13 = vshll.u32 %v276_v27, 16  ;;  %v370_v14 = vor.u32 %v368_v58, %v367_v7  ;;  %v371_v15 = vrot.slane %v367_v7, 4  ;;  %v357_v16 = vshrl.u32 %v273_v6, 16  ;;  %v262_v19 = vpop.permute.xlu1 %261  ;;  %v458_v55 = vld [vmem:[#allocation2 + $0x38] sm:$0xf] }
  0x9e   : > { %v360_v17 = vshll.u32 %v273_v6, 16  ;;  %v429_v20 = vsel %vm2076_vm12, %v354_v9, %v428_v62  ;;  %v432_v21 = vsel %vm1956_vm4, %v355_v10, %v431_v4  ;;  %v383_v41 = vrot.slane %v381_v35, 7  ;;  %v260_v26 = vpop.permute.xlu0 %259  ;;  %v461_v25 = vld [vmem:[#allocation2 + $0x3c] sm:$0x1] }
  0x9f   : > { %v278_v24 = vmax.bf16 %v262_v19, %v2032_v52  ;;  %430 = vst [vmem:[#allocation2 + $0x10] sm:$0xf] %v429_v20  ;;  %433 = vst [vmem:[#allocation2 + $0x14] sm:$0x1] %v432_v21  ;;  %v441_v28 = vsel %vm2076_vm12, %v370_v14, %v440_v5  ;;  %v444_v29 = vsel %vm1956_vm4, %v371_v15, %v443_v11  ;;  %v359_v32 = vrot.slane %v357_v16, 7 }
  0xa0   : > { %v277_v33 = vmax.bf16 %v260_v26, %v2036_v56  ;;  %442 = vst [vmem:[#allocation2 + $0x20] sm:$0xf] %v441_v28  ;;  %445 = vst [vmem:[#allocation2 + $0x24] sm:$0x1] %v444_v29  ;;  %v386_v34 = vor.u32 %v384_v13, %v383_v41  ;;  %v387_v36 = vrot.slane %v383_v41, 4 }
  0xa1   : > { %v397_v52 = vshrl.u32 %v278_v24, 16  ;;  %v400_v38 = vshll.u32 %v278_v24, 16  ;;  %v362_v39 = vor.u32 %v360_v17, %v359_v32  ;;  %v363_v40 = vrot.slane %v359_v32, 4 }
  0xa2   : > { %v389_v42 = vshrl.u32 %v277_v33, 16  ;;  %v392_v43 = vshll.u32 %v277_v33, 16  ;;  %v453_v44 = vsel %vm2076_vm12, %v386_v34, %v452_v23  ;;  %v456_v45 = vsel %vm1956_vm4, %v387_v36, %v455_v30  ;;  %v754_v0 = vld [vmem:[#allocation2 + $0x28] sm:$0xf]  ;;  %v661_v41 = vld [vmem:[#allocation2 + $0x2c] sm:$0x1] }
  0xa3   : > { %v399_v47 = vrot.slane %v397_v52, 7  ;;  %v618_v56 = vpop.permute.xlu0 %617  ;;  %454 = vst [vmem:[#allocation2 + $0x30] sm:$0xf] %v453_v44  ;;  %457 = vst [vmem:[#allocation2 + $0x34] sm:$0x1] %v456_v45  ;;  %v435_v48 = vsel %vm2076_vm12, %v362_v39, %v434_v31  ;;  %v438_v22 = vsel %vm1956_vm4, %v363_v40, %v437_v37  ;;  %v707_v30 = vrot.slane %v661_v41, 5 }
  0xa4   : > { %v391_v50 = vrot.slane %v389_v42, 7  ;;  %v750_v51 = vld [vmem:[#allocation2 + $0x8] sm:$0xf]  ;;  %642 = vst.msk [vmem:[#allocation3] sm:$0xf] %vm641_vm13, %v618_v56 }
  0xa5   : > { %436 = vst [vmem:[#allocation2 + $0x18] sm:$0xf] %v435_v48  ;;  %439 = vst [vmem:[#allocation2 + $0x1c] sm:$0x1] %v438_v22  ;;  %v402_v53 = vor.u32 %v400_v38, %v399_v47  ;;  %v403_v54 = vrot.slane %v399_v47, 4  ;;  %766 = vrot.lane.b32.xlu0 %v750_v51, %s1871_s9 }
  0xa6   : > { %v394_v57 = vor.u32 %v392_v43, %v391_v50  ;;  %v395_v58 = vrot.slane %v391_v50, 4  ;;  %v751_v61 = vld [vmem:[#allocation2 + $0x10] sm:$0xf]  ;;  %v652_v11 = vld [vmem:[#allocation2 + $0x8] sm:$0xe] }
  0xa7   : > { %v465_v59 = vsel %vm2076_vm12, %v402_v53, %v464_v18  ;;  %v468_v60 = vsel %vm1956_vm4, %v403_v54, %v467_v49  ;;  %v718_v62 = vpop.permute.xlu0 %717  ;;  %768 = vrot.lane.b32.xlu1 %v751_v61, %s1871_s9  ;;  %v753_v4 = vld [vmem:[#allocation2 + $0x20] sm:$0xf]  ;;  %v1058_v7 = vld [vmem:[#allocation2 + $0x10] sm:$0xf]  ;;  %v653_v35 = vld [vmem:[#allocation2 + $0xc] sm:$0x1] }
  0xa8   : > { %466 = vst [vmem:[#allocation2 + $0x40] sm:$0xf] %v465_v59  ;;  %469 = vst [vmem:[#allocation2 + $0x44] sm:$0x1] %v468_v60  ;;  %v459_v63 = vsel %vm2076_vm12, %v394_v57, %v458_v55  ;;  %v462_v27 = vsel %vm1956_vm4, %v395_v58, %v461_v25  ;;  %v1060_v10 = vld [vmem:[#allocation2 + $0x20] sm:$0xf] }
  0xa9   : > { %742 = vst.msk [vmem:[#allocation3] sm:$0xf] %vm741_vm14, %v718_v62  ;;  %460 = vst [vmem:[#allocation2 + $0x38] sm:$0xf] %v459_v63  ;;  %774 = vrot.lane.b32.xlu0 %v754_v0, %s1871_s9  ;;  %v658_v13 = vld [vmem:[#allocation2 + $0x20] sm:$0xe] }
  0xaa   : > { %463 = vst [vmem:[#allocation2 + $0x3c] sm:$0x1] %v462_v27  ;;  %v755_v1 = vld [vmem:[#allocation2 + $0x30] sm:$0xf]  ;;  %v659_v14 = vld [vmem:[#allocation2 + $0x24] sm:$0x1] }
  0xab   : > { %776 = vrot.lane.b32.xlu1 %v755_v1, %s1871_s9  ;;  %v1062_v6 = vld [vmem:[#allocation2 + $0x30] sm:$0xf]  ;;  %v1061_v15 = vld [vmem:[#allocation2 + $0x28] sm:$0xf]  ;;  %v1643_v16 = vrot.slane %v652_v11, 9  ;;  %v691_v17 = vrot.slane %v653_v35, 5 }
  0xac   : > { %v752_v3 = vld [vmem:[#allocation2 + $0x18] sm:$0xf]  ;;  %v660_v19 = vld [vmem:[#allocation2 + $0x28] sm:$0xe]  ;;  %v1646_v21 = vrot.slane %v658_v13, 9  ;;  %v703_v23 = vrot.slane %v659_v14, 5 }
  0xad   : > { %770 = vrot.lane.b32.xlu0 %v752_v3, %s1871_s9  ;;  %v1059_v2 = vld [vmem:[#allocation2 + $0x18] sm:$0xf]  ;;  %v654_v24 = vld [vmem:[#allocation2 + $0x10] sm:$0xe]  ;;  %v655_v26 = vld [vmem:[#allocation2 + $0x14] sm:$0x1]  ;;  %v692_v28 = vsel %vm2056_vm11, %v1643_v16, %v691_v17 }
  0xae   : > { %v1647_v29 = vrot.slane %v660_v19, 9  ;;  %v704_v31 = vsel %vm2056_vm11, %v1646_v21, %v703_v23  ;;  %v1644_v32 = vrot.slane %v654_v24, 9  ;;  %v695_v33 = vrot.slane %v655_v26, 5  ;;  %v656_v34 = vld [vmem:[#allocation2 + $0x18] sm:$0xe] }
  0xaf   : > { %772 = vrot.lane.b32.xlu1 %v753_v4, %s1871_s9  ;;  %v757_v46 = vld [vmem:[#allocation2 + $0x40] sm:$0xf]  ;;  %v657_v36 = vld [vmem:[#allocation2 + $0x1c] sm:$0x1]  ;;  %v662_v37 = vld [vmem:[#allocation2 + $0x30] sm:$0xe] }
  0xb0   : > { %v756_v5 = vld [vmem:[#allocation2 + $0x38] sm:$0xf]  ;;  %v1064_v20 = vld [vmem:[#allocation2 + $0x40] sm:$0xf]  ;;  %v663_v52 = vld [vmem:[#allocation2 + $0x34] sm:$0x1]  ;;  %v708_v38 = vsel %vm2056_vm11, %v1647_v29, %v707_v30  ;;  %v696_v44 = vsel %vm2056_vm11, %v1644_v32, %v695_v33 }
  0xb1   : > { %778 = vrot.lane.b32.xlu0 %v756_v5, %s1871_s9  ;;  %v1063_v9 = vld [vmem:[#allocation2 + $0x38] sm:$0xf]  ;;  %v1645_v39 = vrot.slane %v656_v34, 9  ;;  %v699_v40 = vrot.slane %v657_v36, 5  ;;  %v960_v42 = vld [vmem:[#allocation2 + $0x8] sm:$0xe] }
  0xb2   : > { %v961_v43 = vld [vmem:[#allocation2 + $0xc] sm:$0x1]  ;;  %v1648_v45 = vrot.slane %v662_v37, 9  ;;  %v711_v18 = vrot.slane %v663_v52, 5  ;;  %v664_v47 = vld [vmem:[#allocation2 + $0x38] sm:$0xe] }
  0xb3   : > { %780 = vrot.lane.b32.xlu1 %v757_v46, %s1871_s9  ;;  %v665_v56 = vld [vmem:[#allocation2 + $0x3c] sm:$0x1]  ;;  %v1650_v48 = vrot.slane %v960_v42, 9  ;;  %v700_v22 = vsel %vm2056_vm11, %v1645_v39, %v699_v40  ;;  %v994_v49 = vrot.slane %v961_v43, 5  ;;  %v1649_v50 = vrot.slane %v664_v47, 9 }
  0xb4   : > { %v715_v51 = vrot.slane %v665_v56, 5  ;;  %v968_v53 = vld [vmem:[#allocation2 + $0x28] sm:$0xe]  ;;  %v712_v54 = vsel %vm2056_vm11, %v1648_v45, %v711_v18  ;;  %v969_v55 = vld [vmem:[#allocation2 + $0x2c] sm:$0x1]  ;;  %vm1259_vm4 = vcmask 257248  }
  0xb5   : > { %1074 = vrot.lane.b32.xlu0 %v1058_v7, %s1867_s5  ;;  %v962_v25 = vld [vmem:[#allocation2 + $0x10] sm:$0xe]  ;;  %v963_v57 = vld [vmem:[#allocation2 + $0x14] sm:$0x1]  ;;  %v964_v58 = vld [vmem:[#allocation2 + $0x18] sm:$0xe]  ;;  %v995_v27 = vsel %vm2056_vm11, %v1650_v48, %v994_v49 }
  0xb6   : > { %v965_v59 = vld [vmem:[#allocation2 + $0x1c] sm:$0x1]  ;;  %v970_v60 = vld [vmem:[#allocation2 + $0x30] sm:$0xe]  ;;  %v971_v61 = vld [vmem:[#allocation2 + $0x34] sm:$0x1]  ;;  %v716_v0 = vsel %vm2056_vm11, %v1649_v50, %v715_v51 }
  0xb7   : > { %1076 = vrot.lane.b32.xlu1 %v1059_v2, %s1867_s5  ;;  %v2144_v62 = vld [vmem:[#allocation2 + $0x38] sm:$0xe]  ;;  %v2146_v63 = vld [vmem:[#allocation2 + $0x3c] sm:$0x1]  ;;  %v1651_v1 = vrot.slane %v962_v25, 9  ;;  %v998_v3 = vrot.slane %v963_v57, 5 }
  0xb8   : > { %v966_v4 = vld [vmem:[#allocation2 + $0x20] sm:$0xe]  ;;  %v967_v5 = vld [vmem:[#allocation2 + $0x24] sm:$0x1]  ;;  %v1654_v46 = vrot.slane %v968_v53, 9  ;;  %v1010_v7 = vrot.slane %v969_v55, 5 }
  0xb9   : > { %1082 = vrot.lane.b32.xlu0 %v1062_v6, %s1867_s5  ;;  %v1652_v2 = vrot.slane %v964_v58, 9  ;;  %v1002_v6 = vrot.slane %v965_v59, 5  ;;  %v1656_v11 = vrot.slane %v2144_v62, 9  ;;  %v1018_v35 = vrot.slane %v2146_v63, 5  ;;  %v494_v16 = vld [vmem:[#allocation2 + $0x20] sm:$0xf] }
  0xba   : > { %v1653_v13 = vrot.slane %v966_v4, 9  ;;  %v1006_v14 = vrot.slane %v967_v5, 5  ;;  %v999_v17 = vsel %vm2056_vm11, %v1651_v1, %v998_v3  ;;  %v1269_v19 = vld [vmem:[#allocation2 + $0x14] sm:$0x1]  ;;  %v975_v21 = vld [vmem:[#allocation2 + $0x44] sm:$0x1]  ;;  %v1011_v23 = vsel %vm2056_vm11, %v1654_v46, %v1010_v7 }
  0xbb   : > { %1084 = vrot.lane.b32.xlu1 %v1063_v9, %s1867_s5  ;;  %v1655_v9 = vrot.slane %v970_v60, 9  ;;  %v2161_v41 = vld [vmem:[#allocation2 + $0x30] sm:$0xe]  ;;  %v2163_v24 = vld [vmem:[#allocation2 + $0x34] sm:$0x1]  ;;  %v562_v30 = vshrl.u32 %v494_v16, 16  ;;  %v1003_v37 = vsel %vm2056_vm11, %v1652_v2, %v1002_v6  ;;  %v1019_v59 = vsel %vm2056_vm11, %v1656_v11, %v1018_v35 }
  0xbc   : > { %v490_v26 = vld [vmem:[#allocation2 + $0x10] sm:$0xf]  ;;  %v2168_v29 = vld [vmem:[#allocation2 + $0x1c] sm:$0x1]  ;;  %v1302_v33 = vrot.slane %v1269_v19, 5  ;;  %v1022_v36 = vrot.slane %v975_v21, 5 }
  0xbd   : > { %1078 = vrot.lane.b32.xlu0 %v1060_v10, %s1867_s5  ;;  %v1014_v10 = vrot.slane %v971_v61, 5  ;;  %v495_v39 = vld [vmem:[#allocation2 + $0x24] sm:$0x1]  ;;  %v534_v40 = vshrl.u32 %v490_v26, 16  ;;  %v537_v42 = vshll.u32 %v490_v26, 16  ;;  %v1662_v43 = vrot.slane %v2161_v41, 9 }
  0xbe   : > { %v1306_v18 = vrot.slane %v2168_v29, 5  ;;  %v2182_v47 = vld [vmem:[#allocation2 + $0x24] sm:$0x1]  ;;  %v564_v56 = vrot.slane %v562_v30, 4  ;;  %v2185_v50 = vld [vmem:[#allocation2 + $0x38] sm:$0xe] }
  0xbf   : > { %1080 = vrot.lane.b32.xlu1 %v1061_v15, %s1867_s5  ;;  %v1268_v15 = vld [vmem:[#allocation2 + $0x10] sm:$0xe]  ;;  %v1015_v52 = vsel %vm2056_vm11, %v1655_v9, %v1014_v10  ;;  %v2187_v51 = vld [vmem:[#allocation2 + $0x3c] sm:$0x1]  ;;  %v571_v53 = vshll.u32 %v495_v39, 16  ;;  %v536_v57 = vrot.slane %v534_v40, 4 }
  0xc0   : > { %v1658_v32 = vrot.slane %v1268_v15, 9  ;;  %v2191_v55 = vld [vmem:[#allocation2 + $0x28] sm:$0xe]  ;;  %v491_v25 = vld [vmem:[#allocation2 + $0x14] sm:$0x1]  ;;  %v539_v58 = vrot.slane %v537_v42, 5 }
  0xc1   : > { %1086 = vrot.lane.b32.xlu0 %v1064_v20, %s1867_s5  ;;  %v974_v20 = vld [vmem:[#allocation2 + $0x40] sm:$0xe]  ;;  %v489_v61 = vld [vmem:[#allocation2 + $0xc] sm:$0x1]  ;;  %v1310_v1 = vrot.slane %v2182_v47, 5  ;;  %v1663_v3 = vrot.slane %v2185_v50, 9 }
  0xc2   : > { %v1657_v34 = vrot.slane %v974_v20, 9  ;;  %v1303_v60 = vsel %vm2056_vm11, %v1658_v32, %v1302_v33  ;;  %v2203_v5 = vld [vmem:[#allocation2 + $0x2c] sm:$0x1]  ;;  %v496_v46 = vld [vmem:[#allocation2 + $0x28] sm:$0xf]  ;;  %v1322_v7 = vrot.slane %v2187_v51, 5  ;;  %v540_v11 = vor.u32 %v539_v58, %v536_v57 }
  0xc3   : > { %719 = vrot.lane.b32.xlu1 %v692_v28, %s1869_s7  ;;  %v2166_v28 = vld [vmem:[#allocation2 + $0x18] sm:$0xe]  ;;  %v2206_v2 = vrot.slane %v571_v53, 5  ;;  %v1661_v6 = vrot.slane %v2191_v55, 9  ;;  %v543_v9 = vshll.u32 %v491_v25, 16  ;;  %v529_v35 = vshll.u32 %v489_v61, 16 }
  0xc4   : > { %v1659_v45 = vrot.slane %v2166_v28, 9  ;;  %v799_v10 = vld [vmem:[#allocation2 + $0x8] sm:$0xf]  ;;  %v576_v19 = vshrl.u32 %v496_v46, 16  ;;  %v579_v20 = vshll.u32 %v496_v46, 16  ;;  %v1323_v25 = vsel %vm2056_vm11, %v1663_v3, %v1322_v7  ;;  %s1639_s5 = sshll.u32 %s199_s29, 6 }
  0xc5   : > { %725 = vrot.lane.b32.xlu0 %v704_v31, %s1869_s7  ;;  %v565_v31 = vshll.u32 %v494_v16, 16  ;;  %v816_v26 = vshrl.u32 %v799_v10, 16  ;;  %v819_v28 = vshll.u32 %v799_v10, 16  ;;  %v2216_v30 = vrot.slane %v543_v9, 5  ;;  %v2218_v32 = vld [vmem:[#allocation2 + $0x2c] sm:$0x1] }
  0xc6   : > { %v1307_v29 = vsel %vm2056_vm11, %v1659_v45, %v1306_v18  ;;  %v492_v33 = vld [vmem:[#allocation2 + $0x18] sm:$0xf]  ;;  %v807_v39 = vld [vmem:[#allocation2 + $0x28] sm:$0xf]  ;;  %v578_v45 = vrot.slane %v576_v19, 4  ;;  %v581_v18 = vrot.slane %v579_v20, 5 }
  0xc7   : > { %727 = vrot.lane.b32.xlu1 %v708_v38, %s1869_s7  ;;  %v2174_v38 = vld [vmem:[#allocation2 + $0x20] sm:$0xe]  ;;  %v567_v48 = vrot.slane %v565_v31, 5  ;;  %v800_v47 = vld [vmem:[#allocation2 + $0xc] sm:$0x1]  ;;  %v548_v50 = vshrl.u32 %v492_v33, 16 }
  0xc8   : > { %v1660_v49 = vrot.slane %v2174_v38, 9  ;;  %v551_v51 = vshll.u32 %v492_v33, 16  ;;  %v875_v53 = vshll.u32 %v807_v39, 16  ;;  %v493_v58 = vld [vmem:[#allocation2 + $0x1c] sm:$0x1]  ;;  %v825_v38 = vshll.u32 %v800_v47, 16 }
  0xc9   : > { %721 = vrot.lane.b32.xlu0 %v696_v44, %s1869_s7  ;;  %v1318_v44 = vrot.slane %v2163_v24, 5  ;;  %v568_v4 = vor.u32 %v567_v48, %v564_v56  ;;  %v474_v56 = vld [vmem:[#allocation2 + $0x20] sm:$0xf]  ;;  %v818_v48 = vrot.slane %v816_v26, 4  ;;  %v471_v24 = vld [vmem:[#allocation2 + $0x8] sm:$0xf] }
  0xca   : > { %482 = vst.msk [vmem:[#allocation3 + $0x10] sm:$0xf] %vm279_vm0, %v474_v56  ;;  %479 = vst.msk [vmem:[#allocation3 + $0x4] sm:$0xf] %vm279_vm0, %v471_v24  ;;  %v1311_v55 = vsel %vm2056_vm11, %v1660_v49, %v1310_v1  ;;  %v476_v49 = vld [vmem:[#allocation2 + $0x30] sm:$0xf] }
  0xcb   : > { %723 = vrot.lane.b32.xlu1 %v700_v22, %s1869_s7  ;;  %v488_v22 = vld [vmem:[#allocation2 + $0x8] sm:$0xf]  ;;  %v2211_v21 = vrot.slane %v568_v4, 4  ;;  %v1319_v40 = vsel %vm2056_vm11, %v1662_v43, %v1318_v44  ;;  %v585_v43 = vshll.u32 %v2218_v32, 16  ;;  %v872_v44 = vshrl.u32 %v807_v39, 16 }
  0xcc   : > { %v520_v62 = vshrl.u32 %v488_v22, 16  ;;  %v523_v63 = vshll.u32 %v488_v22, 16  ;;  %v821_v22 = vrot.slane %v819_v28, 5  ;;  %v550_v3 = vrot.slane %v548_v50, 4  ;;  %484 = vst.msk [vmem:[#allocation3 + $0x18] sm:$0xf] %vm279_vm0, %v476_v49 }
  0xcd   : > { %729 = vrot.lane.b32.xlu0 %v712_v54, %s1869_s7  ;;  %v1007_v54 = vsel %vm2056_vm11, %v1653_v13, %v1006_v14  ;;  %v499_v13 = vld [vmem:[#allocation2 + $0x34] sm:$0x1]  ;;  %v553_v4 = vrot.slane %v551_v51, 5  ;;  %v477_v46 = vld [vmem:[#allocation2 + $0x38] sm:$0xf]  ;;  %v877_v9 = vrot.slane %v875_v53, 5 }
  0xce   : > { %v522_v16 = vrot.slane %v520_v62, 4  ;;  %v599_v31 = vshll.u32 %v499_v13, 16  ;;  %v822_v1 = vor.u32 %v821_v22, %v818_v48  ;;  %v808_v7 = vld [vmem:[#allocation2 + $0x2c] sm:$0x1]  ;;  %485 = vst.msk [vmem:[#allocation3 + $0x1c] sm:$0xf] %vm279_vm0, %v477_v46 }
  0xcf   : > { %731 = vrot.lane.b32.xlu1 %v716_v0, %s1869_s7  ;;  %v1023_v0 = vsel %vm2056_vm11, %v1657_v34, %v1022_v36  ;;  %v2220_v34 = vrot.slane %v540_v11, 4  ;;  %v2222_v36 = vrot.slane %v529_v35, 5  ;;  %v587_v19 = vrot.slane %v585_v43, 5  ;;  %v809_v56 = vld [vmem:[#allocation2 + $0x30] sm:$0xf] }
  0xd0   : > { %v2233_v41 = vrot.slane %v599_v31, 5  ;;  %v557_v20 = vshll.u32 %v493_v58, 16  ;;  %v554_v26 = vor.u32 %v553_v4, %v550_v3  ;;  %v881_v28 = vshll.u32 %v808_v7, 16  ;;  %v501_v31 = vld [vmem:[#allocation2 + $0x3c] sm:$0x1] }
  0xd1   : > { %1024 = vrot.lane.b32.xlu0 %v995_v27, %s1872_s10  ;;  %v498_v27 = vld [vmem:[#allocation2 + $0x30] sm:$0xf]  ;;  %v613_v51 = vshll.u32 %v501_v31, 16  ;;  %v886_v58 = vshrl.u32 %v809_v56, 16  ;;  %v810_v7 = vld [vmem:[#allocation2 + $0x34] sm:$0x1] }
  0xd2   : > { %v590_v14 = vshrl.u32 %v498_v27, 16  ;;  %v593_v15 = vshll.u32 %v498_v27, 16  ;;  %v803_v27 = vld [vmem:[#allocation2 + $0x18] sm:$0xf]  ;;  %v555_v22 = vrot.slane %v554_v26, 4  ;;  %v2280_v50 = vrot.slane %v881_v28, 5 }
  0xd3   : > { %1026 = vrot.lane.b32.xlu1 %v999_v17, %s1872_s10  ;;  %v525_v17 = vrot.slane %v523_v63, 5  ;;  %v582_v63 = vor.u32 %v581_v18, %v578_v45  ;;  %v844_v13 = vshrl.u32 %v803_v27, 16  ;;  %v559_v45 = vrot.slane %v557_v20, 5  ;;  %v1107_v24 = vld [vmem:[#allocation2 + $0x10] sm:$0xf] }
  0xd4   : > { %v615_v49 = vrot.slane %v613_v51, 5 }
  0xd5   : > { %1032 = vrot.lane.b32.xlu0 %v1011_v23, %s1872_s10  ;;  %v1314_v23 = vrot.slane %v2203_v5, 5  ;;  %v526_v42 = vor.u32 %v525_v17, %v522_v16  ;;  %v473_v5 = vld [vmem:[#allocation2 + $0x18] sm:$0xf]  ;;  %v583_v17 = vrot.slane %v582_v63, 4  ;;  %v1124_v63 = vshrl.u32 %v1107_v24, 16 }
  0xd6   : > { %481 = vst.msk [vmem:[#allocation3 + $0xc] sm:$0xf] %vm279_vm0, %v473_v5 }
  0xd7   : > { %1034 = vrot.lane.b32.xlu1 %v1015_v52, %s1872_s10  ;;  %v595_v52 = vrot.slane %v593_v15, 5  ;;  %v1315_v61 = vsel %vm2056_vm11, %v1661_v6, %v1314_v23  ;;  %v527_v62 = vrot.slane %v526_v42, 4  ;;  %v874_v6 = vrot.slane %v872_v44, 4  ;;  %v801_v15 = vld [vmem:[#allocation2 + $0x10] sm:$0xf] }
  0xd8   : > { %v2267_v23 = vrot.slane %v825_v38, 5  ;;  %v588_v42 = vsel %vm2052_vm9, %v583_v17, %v587_v19  ;;  %v1127_v38 = vshll.u32 %v1107_v24, 16  ;;  %v806_v19 = vld [vmem:[#allocation2 + $0x24] sm:$0x1] }
  0xd9   : > { %1028 = vrot.lane.b32.xlu0 %v1003_v37, %s1872_s10  ;;  %v592_v37 = vrot.slane %v590_v14, 4  ;;  %v847_v14 = vshll.u32 %v803_v27, 16  ;;  %v532_v16 = vsel %vm2052_vm9, %v527_v62, %v2222_v36  ;;  %v560_v27 = vsel %vm2052_vm9, %v555_v22, %v559_v45  ;;  %v1116_v45 = vld [vmem:[#allocation2 + $0x34] sm:$0x1]  ;;  %v1111_v22 = vld [vmem:[#allocation2 + $0x20] sm:$0xf] }
  0xda   : > { %v1129_v17 = vrot.slane %v1127_v38, 5 }
  0xdb   : > { %1030 = vrot.lane.b32.xlu1 %v1007_v54, %s1872_s10  ;;  %v472_v54 = vld [vmem:[#allocation2 + $0x10] sm:$0xf]  ;;  %v596_v57 = vor.u32 %v595_v52, %v592_v37  ;;  %v804_v37 = vld [vmem:[#allocation2 + $0x1c] sm:$0x1]  ;;  %v846_v52 = vrot.slane %v844_v13, 4  ;;  %v849_v39 = vrot.slane %v847_v14, 5 }
  0xdc   : > { %480 = vst.msk [vmem:[#allocation3 + $0x8] sm:$0xf] %vm279_vm0, %v472_v54  ;;  %v853_v44 = vshll.u32 %v804_v37, 16  ;;  %v805_v54 = vld [vmem:[#allocation2 + $0x20] sm:$0xf] }
  0xdd   : > { %1036 = vrot.lane.b32.xlu0 %v1019_v59, %s1872_s10  ;;  %v500_v59 = vld [vmem:[#allocation2 + $0x38] sm:$0xf]  ;;  %v597_v35 = vrot.slane %v596_v57, 4 }
  0xde   : > { %v604_v10 = vshrl.u32 %v500_v59, 16  ;;  %v607_v11 = vshll.u32 %v500_v59, 16  ;;  %v889_v59 = vshll.u32 %v809_v56, 16  ;;  %v855_v5 = vrot.slane %v853_v44, 5  ;;  %v1109_v37 = vld [vmem:[#allocation2 + $0x18] sm:$0xf] }
  0xdf   : > { %1038 = vrot.lane.b32.xlu1 %v1023_v0, %s1872_s10  ;;  %v574_v0 = vsel %vm2052_vm9, %v2211_v21, %v2206_v2  ;;  %v546_v2 = vsel %vm2052_vm9, %v2220_v34, %v2216_v30  ;;  %v2265_v21 = vrot.slane %v822_v1, 4  ;;  %v878_v30 = vor.u32 %v877_v9, %v874_v6  ;;  %v1115_v6 = vld [vmem:[#allocation2 + $0x30] sm:$0xf] }
  0xe0   : > { %v606_v32 = vrot.slane %v604_v10, 4  ;;  %v609_v33 = vrot.slane %v607_v11, 5  ;;  %v830_v34 = vshrl.u32 %v801_v15, 16  ;;  %v602_v36 = vsel %vm2052_vm9, %v597_v35, %v2233_v41  ;;  %v813_v35 = vld [vmem:[#allocation2 + $0x40] sm:$0xf] }
  0xe1   : > { %1332 = vrot.lane.b32.xlu0 %v1303_v60, %s1873_s11  ;;  %v475_v60 = vld [vmem:[#allocation2 + $0x28] sm:$0xf]  ;;  %v828_v48 = vsel %vm2052_vm9, %v2265_v21, %v2267_v23  ;;  %v879_v41 = vrot.slane %v878_v30, 4  ;;  %v861_v1 = vshll.u32 %v805_v54, 16  ;;  %v888_v11 = vrot.slane %v886_v58, 4 }
  0xe2   : > { %483 = vst.msk [vmem:[#allocation3 + $0x14] sm:$0xf] %vm279_vm0, %v475_v60  ;;  %v610_v43 = vor.u32 %v609_v33, %v606_v32  ;;  %v832_v53 = vrot.slane %v830_v34, 4  ;;  %v812_v60 = vld [vmem:[#allocation2 + $0x3c] sm:$0x1]  ;;  %v1180_v23 = vshrl.u32 %v1115_v6, 16 }
  0xe3   : > { %1334 = vrot.lane.b32.xlu1 %v1307_v29, %s1873_s11  ;;  %v811_v29 = vld [vmem:[#allocation2 + $0x38] sm:$0xf]  ;;  %v884_v3 = vsel %vm2052_vm9, %v879_v41, %v2280_v50  ;;  %v909_v10 = vshll.u32 %v812_v60, 16  ;;  %v863_v21 = vrot.slane %v861_v1, 5  ;;  %v1183_v26 = vshll.u32 %v1115_v6, 16 }
  0xe4   : > { %v900_v18 = vshrl.u32 %v811_v29, 16  ;;  %v903_v47 = vshll.u32 %v811_v29, 16  ;;  %v611_v4 = vrot.slane %v610_v43, 4  ;;  %v914_v30 = vshrl.u32 %v813_v35, 16  ;;  %v814_v50 = vld [vmem:[#allocation2 + $0x44] sm:$0x1] }
  0xe5   : > { %1340 = vrot.lane.b32.xlu0 %v1319_v40, %s1873_s11  ;;  %v833_v40 = vshll.u32 %v801_v15, 16  ;;  %v1108_v15 = vld [vmem:[#allocation2 + $0x14] sm:$0x1]  ;;  %v917_v31 = vshll.u32 %v813_v35, 16  ;;  %v911_v33 = vrot.slane %v909_v10, 5  ;;  %v1182_v56 = vrot.slane %v1180_v23, 4 }
  0xe6   : > { %v905_v62 = vrot.slane %v903_v47, 5  ;;  %v616_v28 = vsel %vm2052_vm9, %v611_v4, %v615_v49  ;;  %v916_v51 = vrot.slane %v914_v30, 4  ;;  %v1138_v41 = vshrl.u32 %v1109_v37, 16  ;;  %v1117_v60 = vld [vmem:[#allocation2 + $0x38] sm:$0xf] }
  0xe7   : > { %1342 = vrot.lane.b32.xlu1 %v1323_v25, %s1873_s11  ;;  %v802_v25 = vld [vmem:[#allocation2 + $0x14] sm:$0x1]  ;;  %v835_v57 = vrot.slane %v833_v40, 5  ;;  %v1133_v40 = vshll.u32 %v1108_v15, 16  ;;  %v919_v24 = vrot.slane %v917_v31, 5  ;;  %v1141_v43 = vshll.u32 %v1109_v37, 16 }
  0xe8   : > { %v839_v46 = vshll.u32 %v802_v25, 16  ;;  %v1152_v58 = vshrl.u32 %v1111_v22, 16  ;;  %v923_v38 = vshll.u32 %v814_v50, 16  ;;  %v1112_v1 = vld [vmem:[#allocation2 + $0x24] sm:$0x1]  ;;  %v1194_v6 = vshrl.u32 %v1117_v60, 16 }
  0xe9   : > { %1336 = vrot.lane.b32.xlu0 %v1311_v55, %s1873_s11  ;;  %v850_v55 = vor.u32 %v849_v39, %v846_v52  ;;  %v836_v9 = vor.u32 %v835_v57, %v832_v53  ;;  %v1135_v57 = vrot.slane %v1133_v40, 5  ;;  %v1143_v4 = vrot.slane %v1141_v43, 5  ;;  %v2328_v43 = vpop.permute.xlu1 %1088 }
  0xea   : > { %v841_v29 = vrot.slane %v839_v46, 5  ;;  %v1154_v10 = vrot.slane %v1152_v58, 4  ;;  %vm790_vm0 = vcmask 126048  }
  0xeb   : > { %1338 = vrot.lane.b32.xlu1 %v1315_v61, %s1873_s11  ;;  %v902_v61 = vrot.slane %v900_v18, 4  ;;  %v851_v13 = vrot.slane %v850_v55, 4  ;;  %v837_v32 = vrot.slane %v836_v9, 4  ;;  %v1189_v55 = vshll.u32 %v1116_v45, 16 }
  0xec   : > { %v1197_v9 = vshll.u32 %v1117_v60, 16 }
  0xed   : > { %625 = vrot.lane.b32.xlu0 %v574_v0, %s1868_s6  ;;  %v858_v0 = vshrl.u32 %v805_v54, 16  ;;  %v906_v14 = vor.u32 %v905_v62, %v902_v61  ;;  %v856_v52 = vsel %vm2052_vm9, %v851_v13, %v855_v5  ;;  %v842_v44 = vsel %vm2052_vm9, %v837_v32, %v841_v29  ;;  %v1113_v13 = vld [vmem:[#allocation2 + $0x28] sm:$0xf] }
  0xee   : > { %v1191_v46 = vrot.slane %v1189_v55, 5  ;;  %v1199_v29 = vrot.slane %v1197_v9, 5  ;;  %v1166_v30 = vshrl.u32 %v1113_v13, 16  ;;  %v1169_v31 = vshll.u32 %v1113_v13, 16 }
  0xef   : > { %619 = vrot.lane.b32.xlu1 %v532_v16, %s1868_s6  ;;  %v1126_v16 = vrot.slane %v1124_v63, 4  ;;  %v860_v20 = vrot.slane %v858_v0, 4  ;;  %v907_v39 = vrot.slane %v906_v14, 4  ;;  %v920_v0 = vor.u32 %v919_v24, %v916_v51 }
  0xf1   : > { %621 = vrot.lane.b32.xlu0 %v546_v2, %s1868_s6  ;;  %v891_v2 = vrot.slane %v889_v59, 5  ;;  %v1130_v18 = vor.u32 %v1129_v17, %v1126_v16  ;;  %v864_v47 = vor.u32 %v863_v21, %v860_v20  ;;  %v912_v25 = vsel %vm2052_vm9, %v907_v39, %v911_v33 }
  0xf2   : > { %v1155_v59 = vshll.u32 %v1111_v22, 16  ;;  %v925_v16 = vrot.slane %v923_v38, 5  ;;  %v1161_v17 = vshll.u32 %v1112_v1, 16  ;;  %v921_v20 = vrot.slane %v920_v0, 4  ;;  %v1282_v38 = vld [vmem:[#allocation2 + $0x48] sm:$0xe] }
  0xf3   : > { %627 = vrot.lane.b32.xlu1 %v588_v42, %s1868_s6  ;;  %v892_v34 = vor.u32 %v891_v2, %v888_v11  ;;  %v867_v42 = vshll.u32 %v806_v19, 16  ;;  %v1131_v61 = vrot.slane %v1130_v18, 4  ;;  %v865_v62 = vrot.slane %v864_v47, 4 }
  0xf4   : > { %v1157_v11 = vrot.slane %v1155_v59, 5  ;;  %v1163_v37 = vrot.slane %v1161_v17, 5  ;;  %v926_v40 = vsel %vm2052_vm9, %v921_v20, %v925_v16 }
  0xf5   : > { %629 = vrot.lane.b32.xlu0 %v602_v36, %s1868_s6  ;;  %v895_v36 = vshll.u32 %v810_v7, 16  ;;  %v893_v53 = vrot.slane %v892_v34, 4  ;;  %v869_v63 = vrot.slane %v867_v42, 5  ;;  %v1110_v7 = vld [vmem:[#allocation2 + $0x1c] sm:$0x1]  ;;  %v1136_v14 = vsel %vm2052_vm9, %v1131_v61, %v1135_v57  ;;  %v1783_v57 = vld [vmem:[%s2528_s1] sm:$0xff]  }
  0xf6   : > { %v1147_v23 = vshll.u32 %v1110_v7, 16  ;;  %v1158_v32 = vor.u32 %v1157_v11, %v1154_v10  ;;  %v1280_v61 = vld [vmem:[#allocation2 + $0x40] sm:$0xe]  ;;  %v1665_v7 = vrot.slane %v1282_v38, 9 }
  0xf7   : > { %623 = vrot.lane.b32.xlu1 %v560_v27, %s1868_s6  ;;  %v897_v54 = vrot.slane %v895_v36, 5  ;;  %v1119_v27 = vld [vmem:[#allocation2 + $0x40] sm:$0xf]  ;;  %v870_v15 = vsel %vm2052_vm9, %v865_v62, %v869_v63  ;;  %v1780_v36 = vld [vmem:[%s2528_s1 + $0x10] ss:$0 sps:$4 sm:$0x33]  }
  0xf8   : > { %v1208_v2 = vshrl.u32 %v1119_v27, 16  ;;  %v1211_v35 = vshll.u32 %v1119_v27, 16  ;;  %v1149_v42 = vrot.slane %v1147_v23, 5  ;;  %1712 = vmatprep.subr.msk.bf16.mxu0 %vm1433_vm15, %v1780_v36  ;;  %1713 = vmatprep.subr.msk.bf16.mxu1 %vm1433_vm15, %v1780_v36  ;;  %v1159_v22 = vrot.slane %v1158_v32, 4  ;;  %v1281_v62 = vld [vmem:[#allocation2 + $0x44] sm:$0x1] }
  0xf9   : > { %927 = vrot.lane.b32.xlu0 %v828_v48, %s1874_s18  ;;  %v1185_v48 = vrot.slane %v1183_v26, 5  ;;  %v898_v5 = vsel %vm2052_vm9, %v893_v53, %v897_v54  ;;  %v1118_v26 = vld [vmem:[#allocation2 + $0x3c] sm:$0x1]  ;;  %v1435_v24 = vsel %vm1433_vm15, %v1780_v36, 0  ;;  %v1283_v27 = vld [vmem:[#allocation2 + $0x4c] sm:$0x1] }
  0xfa   : > { %v1210_v33 = vrot.slane %v1208_v2, 4  ;;  %v1213_v34 = vrot.slane %v1211_v35, 5  ;;  %v1203_v45 = vshll.u32 %v1118_v26, 16  ;;  %1693 = vmatpush3.bf16.msra.mxu0 %v1435_v24  ;;  %1709 = vmatpush3.bf16.msra.mxu1 %v1435_v24  ;;  %v1164_v58 = vsel %vm2052_vm9, %v1159_v22, %v1163_v37 }
  0xfb   : > { %631 = vrot.lane.b32.xlu1 %v616_v28, %s1868_s6  ;;  %v1186_v49 = vor.u32 %v1185_v48, %v1182_v56  ;;  %v1196_v28 = vrot.slane %v1194_v6, 4  ;;  %v1168_v56 = vrot.slane %v1166_v30, 4  ;;  %v1171_v48 = vrot.slane %v1169_v31, 5  ;;  %s201_s6 = scalar_lea.vmem [#allocation4], %s1639_s5 }
  0xfc   : > { %v1214_v50 = vor.u32 %v1213_v34, %v1210_v33  ;;  %v1205_v55 = vrot.slane %v1203_v45, 5  ;;  %v1330_v6 = vrot.slane %v1283_v27, 5  ;;  %s1533_s9 = sshll.u32 %s201_s6, 4  ;;  %s2477_s9 = int_to_ptr.vmem [resolvable:$true] %s1533_s9 }
  0xfd   : > { %935 = vrot.lane.b32.xlu0 %v884_v3, %s1874_s18  ;;  %v1140_v3 = vrot.slane %v1138_v41, 4  ;;  %v1187_v19 = vrot.slane %v1186_v49, 4  ;;  %v1200_v47 = vor.u32 %v1199_v29, %v1196_v28  ;;  %v1781_v41 = vld [vmem:[%s2528_s1 + $0x8] sm:$0xff]   ;;  %s1787_s19 = scalar_lea.vmem %s2477_s9, 1024  ;;  %p1794_p1 = scmp.lt.s32.totalorder %s2477_s9, %s1792_s23 }
  0xfe   : > { %1694 = vmatprep.subr.bf16.mxu0 %v1781_v41  ;;  %1707 = vmatprep.subr.bf16.mxu1 %v1781_v41  ;;  %v1215_v59 = vrot.slane %v1214_v50, 4  ;;  %v1331_v2 = vsel %vm2056_vm11, %v1665_v7, %v1330_v6  ;;  %p1788_p12 = scmp.ne.s32.totalorder %s2477_s9, %s1787_s19  ;;  %p1795_p2 = scmp.lt.s32.totalorder %s1793_s26, %s1787_s19 }
  0xff   : > { %929 = vrot.lane.b32.xlu1 %v842_v44, %s1874_s18  ;;  %v1144_v21 = vor.u32 %v1143_v4, %v1140_v3  ;;  %v1192_v39 = vsel %vm2052_vm9, %v1187_v19, %v1191_v46  ;;  %v1114_v44 = vld [vmem:[#allocation2 + $0x2c] sm:$0x1]  ;;  %v1201_v54 = vrot.slane %v1200_v47, 4  ;;  %1695 = vmatpush3.bf16.msra.mxu0 %v1781_v41  ;;  %v2344_v3 = vpop.permute.xlu1 %1249  ;;  %v1664_v4 = vrot.slane %v1280_v61, 9 }
 0x100   : > { %v1175_v63 = vshll.u32 %v1114_v44, 16  ;;  %1710 = vmatpush3.bf16.msra.mxu1 %v1781_v41  ;;  %1696 = vmatprep.subr.bf16.mxu0 %v1783_v57  ;;  %p1789_p13 = pnand %p1788_p12, %p1937_p4  ;;  %p1796_p3 = por %p1795_p2, %p1794_p1 }
 0x101   : > { %931 = vrot.lane.b32.xlu0 %v856_v52, %s1874_s18  ;;  %v1120_v52 = vld [vmem:[#allocation2 + $0x44] sm:$0x1]  ;;  %v1145_v18 = vrot.slane %v1144_v21, 4  ;;  %v1206_v49 = vsel %vm2052_vm9, %v1201_v54, %v1205_v55  ;;  %1708 = vmatprep.subr.bf16.mxu1 %v1783_v57 }
 0x102   : > { %v1217_v51 = vshll.u32 %v1120_v52, 16  ;;  %v1177_v46 = vrot.slane %v1175_v63, 5  ;;  %p1790_p0 = pneg %p1789_p13 }
 0x103   : > { %937 = vrot.lane.b32.xlu1 %v898_v5, %s1874_s18  ;;  %v1150_v53 = vsel %vm2052_vm9, %v1145_v18, %v1149_v42  ;;  %v1326_v5 = vrot.slane %v1281_v62, 5  ;;  %1697 = vmatpush3.bf16.msra.mxu0 %v1783_v57 }
 0x104   : > { %v1219_v60 = vrot.slane %v1217_v51, 5  ;;  %1711 = vmatpush3.bf16.msra.mxu1 %v1783_v57  ;;  %p1797_p5 = pnand %p1796_p3, %p1790_p0 }
 0x105   : > { %939 = vrot.lane.b32.xlu0 %v912_v25, %s1874_s18  ;;  %v1172_v25 = vor.u32 %v1171_v48, %v1168_v56  ;;  %v1327_v11 = vsel %vm2056_vm11, %v1664_v4, %v1326_v5 }
 0x106   : > { %v1220_v1 = vsel %vm2052_vm9, %v1215_v59, %v1219_v60 }
 0x107   : > { %933 = vrot.lane.b32.xlu1 %v870_v15, %s1874_s18  ;;  %v1173_v0 = vrot.slane %v1172_v25, 4 }
 0x109   : > { %1235 = vrot.lane.b32.xlu0 %v1136_v14, %s1870_s8  ;;  %v1178_v10 = vsel %vm2052_vm9, %v1173_v0, %v1177_v46 }
 0x10b   : > { %941 = vrot.lane.b32.xlu1 %v926_v40, %s1874_s18 }
 0x10d   : > { %1243 = vrot.lane.b32.xlu0 %v1192_v39, %s1870_s8 }
 0x10f   : > { %1237 = vrot.lane.b32.xlu1 %v1150_v53, %s1870_s8 }
 0x111   : > { %1239 = vrot.lane.b32.xlu0 %v1164_v58, %s1870_s8 }
 0x113   : > { %1245 = vrot.lane.b32.xlu1 %v1206_v49, %s1870_s8 }
 0x115   : > { %1247 = vrot.lane.b32.xlu0 %v1220_v1, %s1870_s8 }
 0x117   : > { %v767_v9 = vpop.permute.xlu0 %766  ;;  %1241 = vrot.lane.b32.xlu1 %v1178_v10, %s1870_s8  ;;  %s1684_s8 = sshll.u32 %s1855_s15, 10  ;;  %s2481_s15 = scalar_lea.sflag [#allocation5], %s199_s29 }
 0x118   : > { %791 = vst.msk [vmem:[#allocation3] sm:$0xf] %vm790_vm0, %v767_v9  ;;  %s2475_s18 = scalar_lea.hbm %s2530_s3, %s1684_s8 }
 0x119   : > { %1344 = vrot.lane.b32.xlu0 %v1327_v11, %s1873_s11  ;;  %v769_v35 = vpop.permute.xlu1 %768 }
 0x11b   : > { %v775_v13 = vpop.permute.xlu0 %774  ;;  %1346 = vrot.lane.b32.xlu1 %v1331_v2, %s1873_s11  ;;  %v1666_v2 = vld [vmem:[%s2529_s2] ss:$0 sm:$0xff] }
 0x11d   : > { %v777_v14 = vpop.permute.xlu1 %776 }
 0x11f   : > { %v771_v15 = vpop.permute.xlu0 %770 }
 0x121   : > { %v773_v8 = vpop.permute.xlu1 %772 }
 0x123   : > { %v779_v16 = vpop.permute.xlu0 %778 }
 0x125   : > { %v2357_v17 = vpop.permute.xlu1 %780 }
 0x127   : > { %v1075_v19 = vpop.permute.xlu0 %1074 }
 0x129   : > { %v2359_v20 = vpop.permute.xlu1 %1076 }
 0x12b   : > { %v2361_v21 = vpop.permute.xlu0 %1082 }
 0x12d   : > { %v2363_v23 = vpop.permute.xlu1 %1084 }
 0x12f   : > { %v2365_v26 = vpop.permute.xlu0 %1078 }
 0x131   : > { %v2367_v12 = vpop.permute.xlu1 %1080 }
 0x133   : > { %v2369_v28 = vpop.permute.xlu0 %1086 }
 0x135   : > { %v720_v29 = vpop.permute.xlu1 %719 }
 0x137   : > { %v726_v30 = vpop.permute.xlu0 %725 }
 0x139   : > { %v728_v31 = vpop.permute.xlu1 %727 }
 0x13b   : > { %v722_v32 = vpop.permute.xlu0 %721 }
 0x13d   : > { %v724_v33 = vpop.permute.xlu1 %723 }
 0x13f   : > { %v730_v34 = vpop.permute.xlu0 %729 }
 0x141   : > { %v732_v36 = vpop.permute.xlu1 %731 }
 0x143   : > { %v1025_v37 = vpop.permute.xlu0 %1024 }
 0x145   : > { %v1027_v52 = vpop.permute.xlu1 %1026 }
 0x147   : > { %v1033_v39 = vpop.permute.xlu0 %1032 }
 0x149   : > { %v1035_v40 = vpop.permute.xlu1 %1034 }
 0x14b   : > { %v1029_v42 = vpop.permute.xlu0 %1028 }
 0x14d   : > { %v2371_v45 = vpop.permute.xlu1 %1030 }
 0x14f   : > { %v1037_v18 = vpop.permute.xlu0 %1036 }
 0x151   : > { %v2373_v47 = vpop.permute.xlu1 %1038 }
 0x153   : > { %v2375_v56 = vpop.permute.xlu0 %1332 }
 0x155   : > { %v2377_v48 = vpop.permute.xlu1 %1334 }
 0x157   : > { %v2379_v22 = vpop.permute.xlu0 %1340 }
 0x159   : > { %v2381_v50 = vpop.permute.xlu1 %1342 }
 0x15b   : > { %v2383_v51 = vpop.permute.xlu0 %1336 }
 0x15d   : > { %v2385_v24 = vpop.permute.xlu1 %1338 }
 0x15f   : > { %v626_v41 = vpop.permute.xlu0 %625 }
 0x160   : > { %646 = vst.msk [vmem:[#allocation3 + $0x10] sm:$0xf] %vm641_vm13, %v626_v41 }
 0x161   : > { %746 = vst.msk [vmem:[#allocation3 + $0x10] sm:$0xf] %vm741_vm14, %v726_v30  ;;  %v620_v44 = vpop.permute.xlu1 %619 }
 0x162   : > { %795 = vst.msk [vmem:[#allocation3 + $0x10] sm:$0xf] %vm790_vm0, %v775_v13 }
 0x163   : > { %643 = vst.msk [vmem:[#allocation3 + $0x4] sm:$0xf] %vm641_vm13, %v620_v44  ;;  %v622_v53 = vpop.permute.xlu0 %621 }
 0x164   : > { %743 = vst.msk [vmem:[#allocation3 + $0x4] sm:$0xf] %vm741_vm14, %v720_v29 }
 0x165   : > { %644 = vst.msk [vmem:[#allocation3 + $0x8] sm:$0xf] %vm641_vm13, %v622_v53  ;;  %v628_v54 = vpop.permute.xlu1 %627 }
 0x166   : > { %792 = vst.msk [vmem:[#allocation3 + $0x4] sm:$0xf] %vm790_vm0, %v769_v35 }
 0x167   : > { %744 = vst.msk [vmem:[#allocation3 + $0x8] sm:$0xf] %vm741_vm14, %v722_v32  ;;  %v630_v55 = vpop.permute.xlu0 %629 }
 0x168   : > { %793 = vst.msk [vmem:[#allocation3 + $0x8] sm:$0xf] %vm790_vm0, %v771_v15 }
 0x169   : > { %647 = vst.msk [vmem:[#allocation3 + $0x14] sm:$0xf] %vm641_vm13, %v628_v54  ;;  %648 = vst.msk [vmem:[#allocation3 + $0x18] sm:$0xf] %vm641_vm13, %v630_v55  ;;  %v624_v25 = vpop.permute.xlu1 %623 }
 0x16a   : > { %747 = vst.msk [vmem:[#allocation3 + $0x14] sm:$0xf] %vm741_vm14, %v728_v31  ;;  %748 = vst.msk [vmem:[#allocation3 + $0x18] sm:$0xf] %vm741_vm14, %v730_v34 }
 0x16b   : > { %796 = vst.msk [vmem:[#allocation3 + $0x14] sm:$0xf] %vm790_vm0, %v777_v14  ;;  %797 = vst.msk [vmem:[#allocation3 + $0x18] sm:$0xf] %vm790_vm0, %v779_v16  ;;  %v928_v57 = vpop.permute.xlu0 %927 }
 0x16c   : > { %645 = vst.msk [vmem:[#allocation3 + $0xc] sm:$0xf] %vm641_vm13, %v624_v25 }
 0x16d   : > { %745 = vst.msk [vmem:[#allocation3 + $0xc] sm:$0xf] %vm741_vm14, %v724_v33  ;;  %v632_v58 = vpop.permute.xlu1 %631 }
 0x16e   : > { %952 = vst.msk [vmem:[#allocation3] sm:$0xf] %vm951_vm1, %v928_v57 }
 0x16f   : > { %794 = vst.msk [vmem:[#allocation3 + $0xc] sm:$0xf] %vm790_vm0, %v773_v8  ;;  %v936_v59 = vpop.permute.xlu0 %935 }
 0x170   : > { %1049 = vst.msk [vmem:[#allocation3] sm:$0xf] %vm1048_vm2, %v1025_v37 }
 0x171   : > { %1099 = vst.msk [vmem:[#allocation3] sm:$0xf] %vm1098_vm3, %v1075_v19  ;;  %v930_v60 = vpop.permute.xlu1 %929 }
 0x172   : > { %649 = vst.msk [vmem:[#allocation3 + $0x1c] sm:$0xf] %vm641_vm13, %v632_v58 }
 0x173   : > { %749 = vst.msk [vmem:[#allocation3 + $0x1c] sm:$0xf] %vm741_vm14, %v732_v36  ;;  %v932_v61 = vpop.permute.xlu0 %931 }
 0x174   : > { %956 = vst.msk [vmem:[#allocation3 + $0x10] sm:$0xf] %vm951_vm1, %v936_v59  ;;  %953 = vst.msk [vmem:[#allocation3 + $0x4] sm:$0xf] %vm951_vm1, %v930_v60 }
 0x175   : > { %798 = vst.msk [vmem:[#allocation3 + $0x1c] sm:$0xf] %vm790_vm0, %v2357_v17  ;;  %v938_v62 = vpop.permute.xlu1 %937 }
 0x176   : > { %1053 = vst.msk [vmem:[#allocation3 + $0x10] sm:$0xf] %vm1048_vm2, %v1033_v39  ;;  %1050 = vst.msk [vmem:[#allocation3 + $0x4] sm:$0xf] %vm1048_vm2, %v1027_v52 }
 0x177   : > { %1103 = vst.msk [vmem:[#allocation3 + $0x10] sm:$0xf] %vm1098_vm3, %v2361_v21  ;;  %1100 = vst.msk [vmem:[#allocation3 + $0x4] sm:$0xf] %vm1098_vm3, %v2359_v20  ;;  %v940_v63 = vpop.permute.xlu0 %939 }
 0x178   : > { %954 = vst.msk [vmem:[#allocation3 + $0x8] sm:$0xf] %vm951_vm1, %v932_v61  ;;  %957 = vst.msk [vmem:[#allocation3 + $0x14] sm:$0xf] %vm951_vm1, %v938_v62 }
 0x179   : > { %1051 = vst.msk [vmem:[#allocation3 + $0x8] sm:$0xf] %vm1048_vm2, %v1029_v42  ;;  %1054 = vst.msk [vmem:[#allocation3 + $0x14] sm:$0xf] %vm1048_vm2, %v1035_v40  ;;  %v934_v38 = vpop.permute.xlu1 %933 }
 0x17a   : > { %1101 = vst.msk [vmem:[#allocation3 + $0x8] sm:$0xf] %vm1098_vm3, %v2365_v26  ;;  %1104 = vst.msk [vmem:[#allocation3 + $0x14] sm:$0xf] %vm1098_vm3, %v2363_v23 }
 0x17b   : > { %958 = vst.msk [vmem:[#allocation3 + $0x18] sm:$0xf] %vm951_vm1, %v940_v63  ;;  %955 = vst.msk [vmem:[#allocation3 + $0xc] sm:$0xf] %vm951_vm1, %v934_v38  ;;  %v1236_v27 = vpop.permute.xlu0 %1235 }
 0x17c   : > { %1055 = vst.msk [vmem:[#allocation3 + $0x18] sm:$0xf] %vm1048_vm2, %v1037_v18  ;;  %1052 = vst.msk [vmem:[#allocation3 + $0xc] sm:$0xf] %vm1048_vm2, %v2371_v45 }
 0x17d   : > { %1105 = vst.msk [vmem:[#allocation3 + $0x18] sm:$0xf] %vm1098_vm3, %v2369_v28  ;;  %1102 = vst.msk [vmem:[#allocation3 + $0xc] sm:$0xf] %vm1098_vm3, %v2367_v12  ;;  %v942_v49 = vpop.permute.xlu1 %941 }
 0x17e   : > { %1260 = vst.msk [vmem:[#allocation3] sm:$0xf] %vm1259_vm4, %v1236_v27 }
 0x17f   : > { %1357 = vst.msk [vmem:[#allocation3] sm:$0xf] %vm1356_vm5, %v2375_v56  ;;  %v1244_v0 = vpop.permute.xlu0 %1243 }
 0x180   : > { %959 = vst.msk [vmem:[#allocation3 + $0x1c] sm:$0xf] %vm951_vm1, %v942_v49 }
 0x181   : > { %1056 = vst.msk [vmem:[#allocation3 + $0x1c] sm:$0xf] %vm1048_vm2, %v2373_v47  ;;  %v1238_v1 = vpop.permute.xlu1 %1237 }
 0x182   : > { %1264 = vst.msk [vmem:[#allocation3 + $0x10] sm:$0xf] %vm1259_vm4, %v1244_v0  ;;  %1261 = vst.msk [vmem:[#allocation3 + $0x4] sm:$0xf] %vm1259_vm4, %v1238_v1 }
 0x183   : > { %1106 = vst.msk [vmem:[#allocation3 + $0x1c] sm:$0xf] %vm1098_vm3, %v2328_v43  ;;  %v1240_v4 = vpop.permute.xlu0 %1239 }
 0x184   : > { %1361 = vst.msk [vmem:[#allocation3 + $0x10] sm:$0xf] %vm1356_vm5, %v2379_v22  ;;  %1358 = vst.msk [vmem:[#allocation3 + $0x4] sm:$0xf] %vm1356_vm5, %v2377_v48 }
 0x185   : > { %1267 = vst.msk [vmem:[#allocation3 + $0x1c] sm:$0xf] %vm1259_vm4, %v2344_v3  ;;  %1262 = vst.msk [vmem:[#allocation3 + $0x8] sm:$0xf] %vm1259_vm4, %v1240_v4  ;;  %v1246_v5 = vpop.permute.xlu1 %1245 }
 0x186   : > { %1359 = vst.msk [vmem:[#allocation3 + $0x8] sm:$0xf] %vm1356_vm5, %v2383_v51 }
 0x187   : > { %1265 = vst.msk [vmem:[#allocation3 + $0x14] sm:$0xf] %vm1259_vm4, %v1246_v5  ;;  %v1248_v43 = vpop.permute.xlu0 %1247 }
 0x188   : > { %1362 = vst.msk [vmem:[#allocation3 + $0x14] sm:$0xf] %vm1356_vm5, %v2381_v50 }
 0x189   : > { %1266 = vst.msk [vmem:[#allocation3 + $0x18] sm:$0xf] %vm1259_vm4, %v1248_v43  ;;  %v1242_v3 = vpop.permute.xlu1 %1241 }
 0x18a   : > { %1263 = vst.msk [vmem:[#allocation3 + $0xc] sm:$0xf] %vm1259_vm4, %v1242_v3 }
 0x18b   : > { %v1345_v46 = vpop.permute.xlu0 %1344  ;;  %v1782_v7 = vld [vmem:[#allocation3] sm:$0xff]   ;;  %1360 = vst.msk [vmem:[#allocation3 + $0xc] sm:$0xf] %vm1356_vm5, %v2385_v24 }
 0x18c   : > { %1363 = vst.msk [vmem:[#allocation3 + $0x18] sm:$0xf] %vm1356_vm5, %v1345_v46  ;;  %1698 = vmatprep.mubr.msk.bf16.mxu0 %vm1420_vm6, %v1782_v7 }
 0x18d   : > { %v1347_v6 = vpop.permute.xlu1 %1346 }
 0x18e   : > { %1364 = vst.msk [vmem:[#allocation3 + $0x1c] sm:$0xf] %vm1356_vm5, %v1347_v6 }
 0x18f   : > { %v1784_v9 = vld [vmem:[#allocation3 + $0x10] sm:$0xff]  }
 0x190   : > { %1702 = vmatprep.mubr.msk.bf16.mxu1 %vm1420_vm6, %v1784_v9 }
 0x192   : > { %v1785_v10 = vld [vmem:[#allocation3 + $0x8] sm:$0xff]  }
 0x193   : > { %1699 = vmatmul.mubr.msk.bf16.vlgmr.msra.gmra.mxu0 %vm1420_vm6, %v1785_v10 }
 0x195   : > { %v1786_v11 = vld [vmem:[#allocation3 + $0x18] sm:$0xff]  }
 0x196   : > { %1703 = vmatmul.mubr.msk.bf16.vlgmr.msra.gmra.mxu1 %vm1420_vm6, %v1786_v11 }
 0x253   : > { %v1700_v35 = vpop.f32.mrf.mxu0 }
 0x254   : > { %v1480_v13 = vadd.f32 %v1700_v35, %v1666_v2 }
 0x255   : > { %v1471_v14 = vpop.f32.mrf.mxu0 }
 0x256   : > { %v1504_v15 = vmax.f32 %v1480_v13, 0.0  ;;  %v1472_v8 = vadd.f32 %v1666_v2, %v1471_v14  ;;  %v1704_v16 = vpop.f32.mrf.mxu1 }
 0x257   : > { %v1496_v17 = vadd.f32 %v1704_v16, %v1666_v2  ;;  %v1701_v19 = vpop.f32.mrf.mxu0 }
 0x258   : > { %1512 = vst [vmem:[%s201_s6 + $0x10] sm:$0xff] %v1504_v15  ;;  %v1502_v20 = vmax.f32 %v1472_v8, 0.0  ;;  %v1483_v21 = vadd.f32 %v1701_v19, %v1666_v2  ;;  %v1487_v23 = vpop.f32.mrf.mxu1 }
 0x259   : > { %v1508_v26 = vmax.f32 %v1496_v17, 0.0  ;;  %v1488_v12 = vadd.f32 %v1666_v2, %v1487_v23  ;;  %v1474_v28 = vpop.f32.mrf.mxu0 }
 0x25a   : > { %1510 = vst [vmem:[%s201_s6] sm:$0xff] %v1502_v20  ;;  %v1505_v29 = vmax.f32 %v1483_v21, 0.0  ;;  %v1475_v30 = vadd.f32 %v1666_v2, %v1474_v28  ;;  %v1705_v31 = vpop.f32.mrf.mxu1 }
 0x25b   : > { %1516 = vst [vmem:[%s201_s6 + $0x30] sm:$0xff] %v1508_v26  ;;  %v1506_v32 = vmax.f32 %v1488_v12, 0.0  ;;  %v1499_v33 = vadd.f32 %v1705_v31, %v1666_v2 }
 0x25c   : > { %1513 = vst [vmem:[%s201_s6 + $0x18] sm:$0xff] %v1505_v29  ;;  %v1503_v34 = vmax.f32 %v1475_v30, 0.0  ;;  %v1490_v36 = vpop.f32.mrf.mxu1 }
 0x25d   : > { %1514 = vst [vmem:[%s201_s6 + $0x20] sm:$0xff] %v1506_v32  ;;  %v1509_v37 = vmax.f32 %v1499_v33, 0.0  ;;  %v1491_v52 = vadd.f32 %v1666_v2, %v1490_v36 }
 0x25e   : > { %1511 = vst [vmem:[%s201_s6 + $0x8] sm:$0xff] %v1503_v34 }
 0x25f   : > { %1517 = vst [vmem:[%s201_s6 + $0x38] sm:$0xff] %v1509_v37  ;;  %v1507_v39 = vmax.f32 %v1491_v52, 0.0 }
 0x261   : > { %1515 = vst [vmem:[%s201_s6 + $0x28] sm:$0xff] %v1507_v39 }
 0x262   : > { %1800 = shalt.err (!%p1797_p5)
}
 0x263   : > { %s1801_s27 = scalar_lea.hbm %s2475_s18, 1024  ;;  %s1805_s30 = scalar_lea.hbm %s2530_s3, 2048 }
 0x264   : > { %p1802_p6 = scmp.ne.s32.totalorder %s2475_s18, %s1801_s27  ;;  %p1806_p10 = scmp.lt.s32.totalorder %s2475_s18, %s2530_s3 }
 0x265   : > { %p1807_p11 = scmp.lt.s32.totalorder %s1805_s30, %s1801_s27 }
 0x266   : > { %p1803_p7 = pnand %p1802_p6, %p1937_p4 }
 0x267   : > { %p1808_p12 = por %p1807_p11, %p1806_p10 }
 0x268   : > { %p1804_p9 = pneg %p1803_p7 }
 0x26a   : > { %p1809_p13 = pnand %p1808_p12, %p1804_p9 }
 0x26c   : > { %1812 = shalt.err (!%p1809_p13)
}
 0x26d   : > { %s1876_s6 = smov 128  }
 0x26e   : > { %1714 = dma.vmem_to_hbm [thread:$0]  (%p1937_p4), %s2477_s9, 1024, %s2475_s18, %s2481_s15, %s1876_s6, %s1876_s6, %s1869_s7  }
 0x26f PF: > { %p1720_p0 = scmp.ge.s32.totalorder %s1863_s17, 2  ;;  %s1548_s8 = sand.u32 1, %s1843_s12  }
 0x270   : > { %s1549_s10 = scalar_lea.sflag [#allocation5], %s1548_s8 }
 0x271   : > { %p1717_p1 = pnand %p1720_p0, %p1944_p8 }
 0x273   : > { %p1718_p2 = pneg %p1717_p1 }
 0x275   : > { %1838 = dma.done.wait (%p1718_p2), %s1549_s10, 1024  }
 0x276   : > { %1840 = vsyncadd (%p1718_p2), %s1549_s10, 4294966272  ;;  %s16_s17 = sadd.s32 1, %s1863_s17   ;;  %s2543_s12 = smov %s1847_s13 }
 0x277   : > { %p13_p3 = scmp.ge.s32.totalorder %s16_s17, 4   ;;  %s2544_s13 = smov %s1851_s14 }
 0x278   : > { %s2545_s14 = smov %s1950_s25  ;;  %s2546_s15 = smov %s1859_s16 }
 0x279   : > { %s2547_s16 = smov %s2549_s20  ;;  %15 = sbr.rel (!%p13_p3) target bundleno = 4 (0x4), region = 76 }
 0x27e   :  { %1554 = vsyncpa [#allocation5], 1 }
 0x27f   :  { %1556 = vsyncpa [#allocation5 + $0x1], 1 }

</bundles_post_ra>
